<compile_context>
chip_gen: v6e
topology: v6e:2x2x1
jax: 0.10.0
libtpu: 0.0.40
codegen_flags: <defaults>
</compile_context>

<pallas_src>
import jax
import jax.numpy as jnp
import numpy as np
from jax import lax
from jax.experimental import pallas as pl
from jax.experimental.pallas import tpu as pltpu

PAD_IDX = 0


# ----------------------------- Pallas kernel -----------------------------
def _bilstm_layer_kernel(gx_ref, whh_ref, out_ref, hn_ref, cn_ref, h_sc, c_sc):
    """Both directions of one bidirectional LSTM layer.

    grid=(2,): program 0 = forward, program 1 = backward. The two recurrences
    are independent, so the grid axis is "parallel" (one per TC on v7x).

    gx_ref  : (T, B, 4H)  precomputed x @ W_ih^T + (b_ih + b_hh), this dir
    whh_ref : (H, 4H)     recurrent weights (pre-transposed), this dir
    out_ref : (T, B, H)   hidden states over time (whole block stays in VMEM,
                          written back to HBM once per direction)
    hn_ref, cn_ref : (B, H) final hidden / cell state
    """
    d = pl.program_id(0)
    T = gx_ref.shape[0]
    H = hn_ref.shape[-1]

    h_sc[...] = jnp.zeros_like(h_sc)
    c_sc[...] = jnp.zeros_like(c_sc)

    def step(t, carry):
        idx = jnp.where(d == 0, t, T - 1 - t)      # forward / reversed time
        # Only the recurrent matmul lives inside the serial chain.
        # TODO(synk): at production H, cast W_hh/h to bf16 (f32 accumulation)
        # for 2x MXU throughput on v6e/v7x; kept f32 here for exact parity.
        gates = gx_ref[idx] + jnp.dot(h_sc[...], whh_ref[...],
                                      preferred_element_type=jnp.float32)
        i = jax.nn.sigmoid(gates[:, 0:H])
        f = jax.nn.sigmoid(gates[:, H:2 * H])
        g = jnp.tanh(gates[:, 2 * H:3 * H])
        o = jax.nn.sigmoid(gates[:, 3 * H:4 * H])
        c = f * c_sc[...] + i * g
        h = o * jnp.tanh(c)
        c_sc[...] = c
        h_sc[...] = h
        out_ref[idx] = h
        return carry

    lax.fori_loop(0, T, step, 0, unroll=True)      # short static trip count
    hn_ref[...] = h_sc[...]
    cn_ref[...] = c_sc[...]


def bilstm_layer(gx, w_hh_t, hidden_size):
    """One bidirectional LSTM layer.

    gx      : (2, T, B, 4H) precomputed input projection (+bias), both dirs
    w_hh_t  : (2, H, 4H)
    returns : out (2, T, B, H), h_n (2, B, H), c_n (2, B, H)
    """
    _, T, B, _ = gx.shape
    H = hidden_size
    out, h_n, c_n = pl.pallas_call(
        _bilstm_layer_kernel,
        grid=(2,),
        in_specs=[
            pl.BlockSpec((None, T, B, 4 * H), lambda d: (d, 0, 0, 0)),
            pl.BlockSpec((None, H, 4 * H), lambda d: (d, 0, 0)),
        ],
        out_specs=[
            pl.BlockSpec((None, T, B, H), lambda d: (d, 0, 0, 0)),
            pl.BlockSpec((None, B, H), lambda d: (d, 0, 0)),
            pl.BlockSpec((None, B, H), lambda d: (d, 0, 0)),
        ],
        out_shape=[
            jax.ShapeDtypeStruct((2, T, B, H), jnp.float32),
            jax.ShapeDtypeStruct((2, B, H), jnp.float32),
            jax.ShapeDtypeStruct((2, B, H), jnp.float32),
        ],
        scratch_shapes=[
            pltpu.VMEM((B, H), jnp.float32),   # h state
            pltpu.VMEM((B, H), jnp.float32),   # c state
        ],
        compiler_params=pltpu.CompilerParams(
            dimension_semantics=("parallel",)),
    )(gx, w_hh_t)
    return out, h_n, c_n


# ----------------------------- Encoder glue -----------------------------
def init_encoder_params(key, vocab_size, embed_size, hidden_size, num_layers):
    keys = iter(jax.random.split(key, 1 + num_layers * 2 * 4))
    emb = jax.random.normal(next(keys), (vocab_size, embed_size), jnp.float32)
    emb = emb.at[PAD_IDX].set(0.0)          # nn.Embedding padding_idx
    k = 1.0 / np.sqrt(hidden_size)
    lstm = []
    for layer in range(num_layers):
        in_size = embed_size if layer == 0 else 2 * hidden_size
        w_ih_t, w_hh_t, b = [], [], []
        for _ in range(2):                  # forward, backward
            w_ih = jax.random.uniform(next(keys), (4 * hidden_size, in_size),
                                      jnp.float32, -k, k)
            w_hh = jax.random.uniform(next(keys), (4 * hidden_size, hidden_size),
                                      jnp.float32, -k, k)
            b_ih = jax.random.uniform(next(keys), (4 * hidden_size,),
                                      jnp.float32, -k, k)
            b_hh = jax.random.uniform(next(keys), (4 * hidden_size,),
                                      jnp.float32, -k, k)
            w_ih_t.append(w_ih.T)
            w_hh_t.append(w_hh.T)
            b.append(b_ih + b_hh)
        lstm.append(dict(w_ih_t=jnp.stack(w_ih_t),   # (2, in, 4H)
                         w_hh_t=jnp.stack(w_hh_t),   # (2, H, 4H)
                         b=jnp.stack(b)))            # (2, 4H)
    return dict(embedding=emb, lstm=lstm)


def encoder_forward(params, tokens, hidden_size, num_layers):
    """tokens: (B, T) int32 -> (encoder_output, h_n, c_n)."""
    B, T = tokens.shape
    H = hidden_size
    emb = params["embedding"][tokens]            # (B, T, E)  gather (glue)
    x = jnp.transpose(emb, (1, 0, 2))            # (T, B, E)  time-major

    # Pad batch to a multiple of 8 -> sublane-dense (B, ·) tiles in the kernel.
    Bp = max(8, ((B + 7) // 8) * 8)
    if Bp != B:
        x = jnp.pad(x, ((0, 0), (0, Bp - B), (0, 0)))

    h_list, c_list = [], []
    for layer in range(num_layers):
        p = params["lstm"][layer]
        # Hoisted input projection + bias, both directions, one dense matmul.
        gx = jnp.einsum("tbe,deg->dtbg", x, p["w_ih_t"],
                        preferred_element_type=jnp.float32)
        gx = gx + p["b"][:, None, None, :]                    # (2, T, Bp, 4H)
        out, h_n, c_n = bilstm_layer(gx, p["w_hh_t"], H)
        x = jnp.concatenate([out[0], out[1]], axis=-1)        # (T, Bp, 2H)
        h_list.append(jnp.concatenate([h_n[0], h_n[1]], axis=-1)[:B])
        c_list.append(jnp.concatenate([c_n[0], c_n[1]], axis=-1)[:B])
        # TODO(synk): inter-layer dropout (p=0.3) omitted — inference semantics.
    encoder_output = x[:, :B]                                  # (T, B, 2H)
    # PyTorch: h_n is (num_layers*2, B, H); cat(h_n[::2], h_n[1::2], dim=2)
    h_n = jnp.stack(h_list)
    c_n = jnp.stack(c_list)
    return encoder_output, h_n, c_n


# ----------------------------- pure-JAX reference -----------------------------
def _ref_lstm_dir(x, w_ih_t, w_hh_t, b, H, reverse):
    T, B, _ = x.shape
    xs = x[::-1] if reverse else x

    def step(carry, x_t):
        h, c = carry
        gates = x_t @ w_ih_t + h @ w_hh_t + b
        i = jax.nn.sigmoid(gates[:, :H])
        f = jax.nn.sigmoid(gates[:, H:2 * H])
        g = jnp.tanh(gates[:, 2 * H:3 * H])
        o = jax.nn.sigmoid(gates[:, 3 * H:])
        c = f * c + i * g
        h = o * jnp.tanh(c)
        return (h, c), h

    (h_n, c_n), ys = lax.scan(step, (jnp.zeros((B, H)), jnp.zeros((B, H))), xs)
    if reverse:
        ys = ys[::-1]
    return ys, h_n, c_n


def ref_encoder_forward(params, tokens, hidden_size, num_layers):
    emb = params["embedding"][tokens]
    x = jnp.transpose(emb, (1, 0, 2))
    h_list, c_list = [], []
    for layer in range(num_layers):
        p = params["lstm"][layer]
        outs = []
        for d, rev in enumerate((False, True)):
            out, h, c = _ref_lstm_dir(x, p["w_ih_t"][d], p["w_hh_t"][d],
                                      p["b"][d][None, :], hidden_size, rev)
            outs.append(out)
            h_list.append(h)
            c_list.append(c)
        x = jnp.concatenate(outs, axis=-1)
    h_n = jnp.stack([jnp.concatenate([h_list[2 * l], h_list[2 * l + 1]], axis=-1)
                     for l in range(num_layers)])
    c_n = jnp.stack([jnp.concatenate([c_list[2 * l], c_list[2 * l + 1]], axis=-1)
                     for l in range(num_layers)])
    return x, h_n, c_n


# ----------------------------- main -----------------------------
if __name__ == "__main__":
    vocab_size, embed_size, hidden_size, num_layers = 50, 16, 32, 2
    batch, seq_len = 2, 8

    root = jax.random.PRNGKey(0)
    pkey, tkey = jax.random.split(root)
    params = init_encoder_params(pkey, vocab_size, embed_size,
                                 hidden_size, num_layers)
    tokens = jax.random.randint(tkey, (batch, seq_len), 0, vocab_size,
                                dtype=jnp.int32)

    enc_out, h_n, c_n = encoder_forward(params, tokens, hidden_size, num_layers)
    jax.block_until_ready((enc_out, h_n, c_n))

    assert enc_out.shape == (seq_len, batch, 2 * hidden_size)
    assert h_n.shape == (num_layers, batch, 2 * hidden_size)
    assert c_n.shape == (num_layers, batch, 2 * hidden_size)

    ro, rh, rc = ref_encoder_forward(params, tokens, hidden_size, num_layers)
    np.testing.assert_allclose(np.asarray(enc_out), np.asarray(ro),
                               rtol=2e-4, atol=2e-4)
    np.testing.assert_allclose(np.asarray(h_n), np.asarray(rh),
                               rtol=2e-4, atol=2e-4)
    np.testing.assert_allclose(np.asarray(c_n), np.asarray(rc),
                               rtol=2e-4, atol=2e-4)

    print("KERNEL_OK")
</pallas_src>

<mosaic_0001>
module attributes {stable_mosaic.version = 11 : i64} {
  func.func @_bilstm_layer_kernel(%arg0: i32, %arg1: memref<1x8x8x128xf32, #tpu.memory_space<vmem>>, %arg2: memref<1x32x128xf32, #tpu.memory_space<vmem>>, %arg3: memref<1x8x8x32xf32, #tpu.memory_space<vmem>>, %arg4: memref<1x8x32xf32, #tpu.memory_space<vmem>>, %arg5: memref<1x8x32xf32, #tpu.memory_space<vmem>>, %arg6: memref<8x32xf32, #tpu.memory_space<vmem>>, %arg7: memref<8x32xf32, #tpu.memory_space<vmem>>) attributes {dimension_semantics = [#tpu.dimension_semantics<parallel>], iteration_bounds = array<i64: 2>, scalar_prefetch = 0 : i64, scratch_operands = 2 : i64, tpu.core_type = #tpu.core_type<tc>, window_params = [{transform_indices = @transform_0, window_bounds = array<i64: 1, 8, 8, 128>}, {transform_indices = @transform_1, window_bounds = array<i64: 1, 32, 128>}, {transform_indices = @transform_2, window_bounds = array<i64: 1, 8, 8, 32>}, {transform_indices = @transform_3, window_bounds = array<i64: 1, 8, 32>}, {transform_indices = @transform_4, window_bounds = array<i64: 1, 8, 32>}]} {
    %cst = arith.constant 0.000000e+00 : f32
    %0 = vector.broadcast %cst : f32 to vector<8x32xf32>
    %c0 = arith.constant 0 : index
    %c0_0 = arith.constant 0 : index
    %1 = vector.load %arg6[%c0, %c0_0] : memref<8x32xf32, #tpu.memory_space<vmem>>, vector<8x32xf32>
    tpu.vector_store %arg6[%c0, %c0_0], %0 {strides = array<i32>} : memref<8x32xf32, #tpu.memory_space<vmem>>, vector<8x32xf32>,
    %cst_1 = arith.constant 0.000000e+00 : f32
    %2 = vector.broadcast %cst_1 : f32 to vector<8x32xf32>
    %c0_2 = arith.constant 0 : index
    %c0_3 = arith.constant 0 : index
    %3 = vector.load %arg7[%c0_2, %c0_3] : memref<8x32xf32, #tpu.memory_space<vmem>>, vector<8x32xf32>
    tpu.vector_store %arg7[%c0_2, %c0_3], %2 {strides = array<i32>} : memref<8x32xf32, #tpu.memory_space<vmem>>, vector<8x32xf32>,
    %c0_i32 = arith.constant 0 : i32
    %c0_i32_4 = arith.constant 0 : i32
    %4 = arith.cmpi eq, %arg0, %c0_i32_4 : i32
    %c7_i32 = arith.constant 7 : i32
    %5 = arith.subi %c7_i32, %c0_i32 : i32
    %6 = arith.select %4, %c0_i32, %5 : i32
    %c0_5 = arith.constant 0 : index
    %7 = arith.index_cast %6 : i32 to index
    %c0_6 = arith.constant 0 : index
    %c0_7 = arith.constant 0 : index
    %8 = vector.load %arg1[%c0_5, %7, %c0_6, %c0_7] : memref<1x8x8x128xf32, #tpu.memory_space<vmem>>, vector<1x1x8x128xf32>
    %9 = vector.shape_cast %8 : vector<1x1x8x128xf32> to vector<8x128xf32>
    %c0_8 = arith.constant 0 : index
    %c0_9 = arith.constant 0 : index
    %10 = vector.load %arg6[%c0_8, %c0_9] : memref<8x32xf32, #tpu.memory_space<vmem>>, vector<8x32xf32>
    %c0_10 = arith.constant 0 : index
    %c0_11 = arith.constant 0 : index
    %c0_12 = arith.constant 0 : index
    %11 = vector.load %arg2[%c0_10, %c0_11, %c0_12] : memref<1x32x128xf32, #tpu.memory_space<vmem>>, vector<1x32x128xf32>
    %12 = vector.shape_cast %11 : vector<1x32x128xf32> to vector<32x128xf32>
    %cst_13 = arith.constant dense<0.000000e+00> : vector<8x128xf32>
    %13 = tpu.matmul %10, %12, %cst_13 {dimension_numbers = #tpu.dot_dimension_numbers<[1], [0], [0], [1], [0, 0, 1, 1], [], []>} : vector<8x32xf32>, vector<32x128xf32>, vector<8x128xf32> -> vector<8x128xf32>
    %14 = arith.addf %9, %13 : vector<8x128xf32>
    %15 = vector.extract_strided_slice %14 {offsets = [0, 0], sizes = [8, 32], strides = [1, 1]} : vector<8x128xf32> to vector<8x32xf32>
    %16 = arith.negf %15 : vector<8x32xf32>
    %17 = math.exp %16 : vector<8x32xf32>
    %cst_14 = arith.constant 1.000000e+00 : f32
    %18 = vector.broadcast %cst_14 : f32 to vector<8x32xf32>
    %19 = arith.addf %18, %17 : vector<8x32xf32>
    %20 = arith.divf %18, %19 : vector<8x32xf32>
    %21 = vector.extract_strided_slice %14 {offsets = [0, 32], sizes = [8, 32], strides = [1, 1]} : vector<8x128xf32> to vector<8x32xf32>
    %22 = arith.negf %21 : vector<8x32xf32>
    %23 = math.exp %22 : vector<8x32xf32>
    %cst_15 = arith.constant 1.000000e+00 : f32
    %24 = vector.broadcast %cst_15 : f32 to vector<8x32xf32>
    %25 = arith.addf %24, %23 : vector<8x32xf32>
    %26 = arith.divf %24, %25 : vector<8x32xf32>
    %27 = vector.extract_strided_slice %14 {offsets = [0, 64], sizes = [8, 32], strides = [1, 1]} : vector<8x128xf32> to vector<8x32xf32>
    %28 = math.tanh %27 : vector<8x32xf32>
    %29 = vector.extract_strided_slice %14 {offsets = [0, 96], sizes = [8, 32], strides = [1, 1]} : vector<8x128xf32> to vector<8x32xf32>
    %30 = arith.negf %29 : vector<8x32xf32>
    %31 = math.exp %30 : vector<8x32xf32>
    %cst_16 = arith.constant 1.000000e+00 : f32
    %32 = vector.broadcast %cst_16 : f32 to vector<8x32xf32>
    %33 = arith.addf %32, %31 : vector<8x32xf32>
    %34 = arith.divf %32, %33 : vector<8x32xf32>
    %c0_17 = arith.constant 0 : index
    %c0_18 = arith.constant 0 : index
    %35 = vector.load %arg7[%c0_17, %c0_18] : memref<8x32xf32, #tpu.memory_space<vmem>>, vector<8x32xf32>
    %36 = arith.mulf %26, %35 : vector<8x32xf32>
    %37 = arith.mulf %20, %28 : vector<8x32xf32>
    %38 = arith.addf %36, %37 : vector<8x32xf32>
    %39 = math.tanh %38 : vector<8x32xf32>
    %40 = arith.mulf %34, %39 : vector<8x32xf32>
    %c0_19 = arith.constant 0 : index
    %c0_20 = arith.constant 0 : index
    %41 = vector.load %arg7[%c0_19, %c0_20] : memref<8x32xf32, #tpu.memory_space<vmem>>, vector<8x32xf32>
    tpu.vector_store %arg7[%c0_19, %c0_20], %38 {strides = array<i32>} : memref<8x32xf32, #tpu.memory_space<vmem>>, vector<8x32xf32>,
    %c0_21 = arith.constant 0 : index
    %c0_22 = arith.constant 0 : index
    %42 = vector.load %arg6[%c0_21, %c0_22] : memref<8x32xf32, #tpu.memory_space<vmem>>, vector<8x32xf32>
    tpu.vector_store %arg6[%c0_21, %c0_22], %40 {strides = array<i32>} : memref<8x32xf32, #tpu.memory_space<vmem>>, vector<8x32xf32>,
    %c0_23 = arith.constant 0 : index
    %43 = arith.index_cast %6 : i32 to index
    %c0_24 = arith.constant 0 : index
    %c0_25 = arith.constant 0 : index
    %44 = vector.load %arg3[%c0_23, %43, %c0_24, %c0_25] : memref<1x8x8x32xf32, #tpu.memory_space<vmem>>, vector<1x1x8x32xf32>
    %45 = vector.shape_cast %44 : vector<1x1x8x32xf32> to vector<8x32xf32>
    %46 = vector.shape_cast %40 : vector<8x32xf32> to vector<1x1x8x32xf32>
    tpu.vector_store %arg3[%c0_23, %43, %c0_24, %c0_25], %46 {strides = array<i32>} : memref<1x8x8x32xf32, #tpu.memory_space<vmem>>, vector<1x1x8x32xf32>,
    %c1_i32 = arith.constant 1 : i32
    %c0_i32_26 = arith.constant 0 : i32
    %47 = arith.cmpi eq, %arg0, %c0_i32_26 : i32
    %c7_i32_27 = arith.constant 7 : i32
    %48 = arith.subi %c7_i32_27, %c1_i32 : i32
    %49 = arith.select %47, %c1_i32, %48 : i32
    %c0_28 = arith.constant 0 : index
    %50 = arith.index_cast %49 : i32 to index
    %c0_29 = arith.constant 0 : index
    %c0_30 = arith.constant 0 : index
    %51 = vector.load %arg1[%c0_28, %50, %c0_29, %c0_30] : memref<1x8x8x128xf32, #tpu.memory_space<vmem>>, vector<1x1x8x128xf32>
    %52 = vector.shape_cast %51 : vector<1x1x8x128xf32> to vector<8x128xf32>
    %c0_31 = arith.constant 0 : index
    %c0_32 = arith.constant 0 : index
    %53 = vector.load %arg6[%c0_31, %c0_32] : memref<8x32xf32, #tpu.memory_space<vmem>>, vector<8x32xf32>
    %c0_33 = arith.constant 0 : index
    %c0_34 = arith.constant 0 : index
    %c0_35 = arith.constant 0 : index
    %54 = vector.load %arg2[%c0_33, %c0_34, %c0_35] : memref<1x32x128xf32, #tpu.memory_space<vmem>>, vector<1x32x128xf32>
    %55 = vector.shape_cast %54 : vector<1x32x128xf32> to vector<32x128xf32>
    %cst_36 = arith.constant dense<0.000000e+00> : vector<8x128xf32>
    %56 = tpu.matmul %53, %55, %cst_36 {dimension_numbers = #tpu.dot_dimension_numbers<[1], [0], [0], [1], [0, 0, 1, 1], [], []>} : vector<8x32xf32>, vector<32x128xf32>, vector<8x128xf32> -> vector<8x128xf32>
    %57 = arith.addf %52, %56 : vector<8x128xf32>
    %58 = vector.extract_strided_slice %57 {offsets = [0, 0], sizes = [8, 32], strides = [1, 1]} : vector<8x128xf32> to vector<8x32xf32>
    %59 = arith.negf %58 : vector<8x32xf32>
    %60 = math.exp %59 : vector<8x32xf32>
    %cst_37 = arith.constant 1.000000e+00 : f32
    %61 = vector.broadcast %cst_37 : f32 to vector<8x32xf32>
    %62 = arith.addf %61, %60 : vector<8x32xf32>
    %63 = arith.divf %61, %62 : vector<8x32xf32>
    %64 = vector.extract_strided_slice %57 {offsets = [0, 32], sizes = [8, 32], strides = [1, 1]} : vector<8x128xf32> to vector<8x32xf32>
    %65 = arith.negf %64 : vector<8x32xf32>
    %66 = math.exp %65 : vector<8x32xf32>
    %cst_38 = arith.constant 1.000000e+00 : f32
    %67 = vector.broadcast %cst_38 : f32 to vector<8x32xf32>
    %68 = arith.addf %67, %66 : vector<8x32xf32>
    %69 = arith.divf %67, %68 : vector<8x32xf32>
    %70 = vector.extract_strided_slice %57 {offsets = [0, 64], sizes = [8, 32], strides = [1, 1]} : vector<8x128xf32> to vector<8x32xf32>
    %71 = math.tanh %70 : vector<8x32xf32>
    %72 = vector.extract_strided_slice %57 {offsets = [0, 96], sizes = [8, 32], strides = [1, 1]} : vector<8x128xf32> to vector<8x32xf32>
    %73 = arith.negf %72 : vector<8x32xf32>
    %74 = math.exp %73 : vector<8x32xf32>
    %cst_39 = arith.constant 1.000000e+00 : f32
    %75 = vector.broadcast %cst_39 : f32 to vector<8x32xf32>
    %76 = arith.addf %75, %74 : vector<8x32xf32>
    %77 = arith.divf %75, %76 : vector<8x32xf32>
    %c0_40 = arith.constant 0 : index
    %c0_41 = arith.constant 0 : index
    %78 = vector.load %arg7[%c0_40, %c0_41] : memref<8x32xf32, #tpu.memory_space<vmem>>, vector<8x32xf32>
    %79 = arith.mulf %69, %78 : vector<8x32xf32>
    %80 = arith.mulf %63, %71 : vector<8x32xf32>
    %81 = arith.addf %79, %80 : vector<8x32xf32>
    %82 = math.tanh %81 : vector<8x32xf32>
    %83 = arith.mulf %77, %82 : vector<8x32xf32>
    %c0_42 = arith.constant 0 : index
    %c0_43 = arith.constant 0 : index
    %84 = vector.load %arg7[%c0_42, %c0_43] : memref<8x32xf32, #tpu.memory_space<vmem>>, vector<8x32xf32>
    tpu.vector_store %arg7[%c0_42, %c0_43], %81 {strides = array<i32>} : memref<8x32xf32, #tpu.memory_space<vmem>>, vector<8x32xf32>,
    %c0_44 = arith.constant 0 : index
    %c0_45 = arith.constant 0 : index
    %85 = vector.load %arg6[%c0_44, %c0_45] : memref<8x32xf32, #tpu.memory_space<vmem>>, vector<8x32xf32>
    tpu.vector_store %arg6[%c0_44, %c0_45], %83 {strides = array<i32>} : memref<8x32xf32, #tpu.memory_space<vmem>>, vector<8x32xf32>,
    %c0_46 = arith.constant 0 : index
    %86 = arith.index_cast %49 : i32 to index
    %c0_47 = arith.constant 0 : index
    %c0_48 = arith.constant 0 : index
    %87 = vector.load %arg3[%c0_46, %86, %c0_47, %c0_48] : memref<1x8x8x32xf32, #tpu.memory_space<vmem>>, vector<1x1x8x32xf32>
    %88 = vector.shape_cast %87 : vector<1x1x8x32xf32> to vector<8x32xf32>
    %89 = vector.shape_cast %83 : vector<8x32xf32> to vector<1x1x8x32xf32>
    tpu.vector_store %arg3[%c0_46, %86, %c0_47, %c0_48], %89 {strides = array<i32>} : memref<1x8x8x32xf32, #tpu.memory_space<vmem>>, vector<1x1x8x32xf32>,
    %c2_i32 = arith.constant 2 : i32
    %c0_i32_49 = arith.constant 0 : i32
    %90 = arith.cmpi eq, %arg0, %c0_i32_49 : i32
    %c7_i32_50 = arith.constant 7 : i32
    %91 = arith.subi %c7_i32_50, %c2_i32 : i32
    %92 = arith.select %90, %c2_i32, %91 : i32
    %c0_51 = arith.constant 0 : index
    %93 = arith.index_cast %92 : i32 to index
    %c0_52 = arith.constant 0 : index
    %c0_53 = arith.constant 0 : index
    %94 = vector.load %arg1[%c0_51, %93, %c0_52, %c0_53] : memref<1x8x8x128xf32, #tpu.memory_space<vmem>>, vector<1x1x8x128xf32>
    %95 = vector.shape_cast %94 : vector<1x1x8x128xf32> to vector<8x128xf32>
    %c0_54 = arith.constant 0 : index
    %c0_55 = arith.constant 0 : index
    %96 = vector.load %arg6[%c0_54, %c0_55] : memref<8x32xf32, #tpu.memory_space<vmem>>, vector<8x32xf32>
    %c0_56 = arith.constant 0 : index
    %c0_57 = arith.constant 0 : index
    %c0_58 = arith.constant 0 : index
    %97 = vector.load %arg2[%c0_56, %c0_57, %c0_58] : memref<1x32x128xf32, #tpu.memory_space<vmem>>, vector<1x32x128xf32>
    %98 = vector.shape_cast %97 : vector<1x32x128xf32> to vector<32x128xf32>
    %cst_59 = arith.constant dense<0.000000e+00> : vector<8x128xf32>
    %99 = tpu.matmul %96, %98, %cst_59 {dimension_numbers = #tpu.dot_dimension_numbers<[1], [0], [0], [1], [0, 0, 1, 1], [], []>} : vector<8x32xf32>, vector<32x128xf32>, vector<8x128xf32> -> vector<8x128xf32>
    %100 = arith.addf %95, %99 : vector<8x128xf32>
    %101 = vector.extract_strided_slice %100 {offsets = [0, 0], sizes = [8, 32], strides = [1, 1]} : vector<8x128xf32> to vector<8x32xf32>
    %102 = arith.negf %101 : vector<8x32xf32>
    %103 = math.exp %102 : vector<8x32xf32>
    %cst_60 = arith.constant 1.000000e+00 : f32
    %104 = vector.broadcast %cst_60 : f32 to vector<8x32xf32>
    %105 = arith.addf %104, %103 : vector<8x32xf32>
    %106 = arith.divf %104, %105 : vector<8x32xf32>
    %107 = vector.extract_strided_slice %100 {offsets = [0, 32], sizes = [8, 32], strides = [1, 1]} : vector<8x128xf32> to vector<8x32xf32>
    %108 = arith.negf %107 : vector<8x32xf32>
    %109 = math.exp %108 : vector<8x32xf32>
    %cst_61 = arith.constant 1.000000e+00 : f32
    %110 = vector.broadcast %cst_61 : f32 to vector<8x32xf32>
    %111 = arith.addf %110, %109 : vector<8x32xf32>
    %112 = arith.divf %110, %111 : vector<8x32xf32>
    %113 = vector.extract_strided_slice %100 {offsets = [0, 64], sizes = [8, 32], strides = [1, 1]} : vector<8x128xf32> to vector<8x32xf32>
    %114 = math.tanh %113 : vector<8x32xf32>
    %115 = vector.extract_strided_slice %100 {offsets = [0, 96], sizes = [8, 32], strides = [1, 1]} : vector<8x128xf32> to vector<8x32xf32>
    %116 = arith.negf %115 : vector<8x32xf32>
    %117 = math.exp %116 : vector<8x32xf32>
    %cst_62 = arith.constant 1.000000e+00 : f32
    %118 = vector.broadcast %cst_62 : f32 to vector<8x32xf32>
    %119 = arith.addf %118, %117 : vector<8x32xf32>
    %120 = arith.divf %118, %119 : vector<8x32xf32>
    %c0_63 = arith.constant 0 : index
    %c0_64 = arith.constant 0 : index
    %121 = vector.load %arg7[%c0_63, %c0_64] : memref<8x32xf32, #tpu.memory_space<vmem>>, vector<8x32xf32>
    %122 = arith.mulf %112, %121 : vector<8x32xf32>
    %123 = arith.mulf %106, %114 : vector<8x32xf32>
    %124 = arith.addf %122, %123 : vector<8x32xf32>
    %125 = math.tanh %124 : vector<8x32xf32>
    %126 = arith.mulf %120, %125 : vector<8x32xf32>
    %c0_65 = arith.constant 0 : index
    %c0_66 = arith.constant 0 : index
    %127 = vector.load %arg7[%c0_65, %c0_66] : memref<8x32xf32, #tpu.memory_space<vmem>>, vector<8x32xf32>
    tpu.vector_store %arg7[%c0_65, %c0_66], %124 {strides = array<i32>} : memref<8x32xf32, #tpu.memory_space<vmem>>, vector<8x32xf32>,
    %c0_67 = arith.constant 0 : index
    %c0_68 = arith.constant 0 : index
    %128 = vector.load %arg6[%c0_67, %c0_68] : memref<8x32xf32, #tpu.memory_space<vmem>>, vector<8x32xf32>
    tpu.vector_store %arg6[%c0_67, %c0_68], %126 {strides = array<i32>} : memref<8x32xf32, #tpu.memory_space<vmem>>, vector<8x32xf32>,
    %c0_69 = arith.constant 0 : index
    %129 = arith.index_cast %92 : i32 to index
    %c0_70 = arith.constant 0 : index
    %c0_71 = arith.constant 0 : index
    %130 = vector.load %arg3[%c0_69, %129, %c0_70, %c0_71] : memref<1x8x8x32xf32, #tpu.memory_space<vmem>>, vector<1x1x8x32xf32>
    %131 = vector.shape_cast %130 : vector<1x1x8x32xf32> to vector<8x32xf32>
    %132 = vector.shape_cast %126 : vector<8x32xf32> to vector<1x1x8x32xf32>
    tpu.vector_store %arg3[%c0_69, %129, %c0_70, %c0_71], %132 {strides = array<i32>} : memref<1x8x8x32xf32, #tpu.memory_space<vmem>>, vector<1x1x8x32xf32>,
    %c3_i32 = arith.constant 3 : i32
    %c0_i32_72 = arith.constant 0 : i32
    %133 = arith.cmpi eq, %arg0, %c0_i32_72 : i32
    %c7_i32_73 = arith.constant 7 : i32
    %134 = arith.subi %c7_i32_73, %c3_i32 : i32
    %135 = arith.select %133, %c3_i32, %134 : i32
    %c0_74 = arith.constant 0 : index
    %136 = arith.index_cast %135 : i32 to index
    %c0_75 = arith.constant 0 : index
    %c0_76 = arith.constant 0 : index
    %137 = vector.load %arg1[%c0_74, %136, %c0_75, %c0_76] : memref<1x8x8x128xf32, #tpu.memory_space<vmem>>, vector<1x1x8x128xf32>
    %138 = vector.shape_cast %137 : vector<1x1x8x128xf32> to vector<8x128xf32>
    %c0_77 = arith.constant 0 : index
    %c0_78 = arith.constant 0 : index
    %139 = vector.load %arg6[%c0_77, %c0_78] : memref<8x32xf32, #tpu.memory_space<vmem>>, vector<8x32xf32>
    %c0_79 = arith.constant 0 : index
    %c0_80 = arith.constant 0 : index
    %c0_81 = arith.constant 0 : index
    %140 = vector.load %arg2[%c0_79, %c0_80, %c0_81] : memref<1x32x128xf32, #tpu.memory_space<vmem>>, vector<1x32x128xf32>
    %141 = vector.shape_cast %140 : vector<1x32x128xf32> to vector<32x128xf32>
    %cst_82 = arith.constant dense<0.000000e+00> : vector<8x128xf32>
    %142 = tpu.matmul %139, %141, %cst_82 {dimension_numbers = #tpu.dot_dimension_numbers<[1], [0], [0], [1], [0, 0, 1, 1], [], []>} : vector<8x32xf32>, vector<32x128xf32>, vector<8x128xf32> -> vector<8x128xf32>
    %143 = arith.addf %138, %142 : vector<8x128xf32>
    %144 = vector.extract_strided_slice %143 {offsets = [0, 0], sizes = [8, 32], strides = [1, 1]} : vector<8x128xf32> to vector<8x32xf32>
    %145 = arith.negf %144 : vector<8x32xf32>
    %146 = math.exp %145 : vector<8x32xf32>
    %cst_83 = arith.constant 1.000000e+00 : f32
    %147 = vector.broadcast %cst_83 : f32 to vector<8x32xf32>
    %148 = arith.addf %147, %146 : vector<8x32xf32>
    %149 = arith.divf %147, %148 : vector<8x32xf32>
    %150 = vector.extract_strided_slice %143 {offsets = [0, 32], sizes = [8, 32], strides = [1, 1]} : vector<8x128xf32> to vector<8x32xf32>
    %151 = arith.negf %150 : vector<8x32xf32>
    %152 = math.exp %151 : vector<8x32xf32>
    %cst_84 = arith.constant 1.000000e+00 : f32
    %153 = vector.broadcast %cst_84 : f32 to vector<8x32xf32>
    %154 = arith.addf %153, %152 : vector<8x32xf32>
    %155 = arith.divf %153, %154 : vector<8x32xf32>
    %156 = vector.extract_strided_slice %143 {offsets = [0, 64], sizes = [8, 32], strides = [1, 1]} : vector<8x128xf32> to vector<8x32xf32>
    %157 = math.tanh %156 : vector<8x32xf32>
    %158 = vector.extract_strided_slice %143 {offsets = [0, 96], sizes = [8, 32], strides = [1, 1]} : vector<8x128xf32> to vector<8x32xf32>
    %159 = arith.negf %158 : vector<8x32xf32>
    %160 = math.exp %159 : vector<8x32xf32>
    %cst_85 = arith.constant 1.000000e+00 : f32
    %161 = vector.broadcast %cst_85 : f32 to vector<8x32xf32>
    %162 = arith.addf %161, %160 : vector<8x32xf32>
    %163 = arith.divf %161, %162 : vector<8x32xf32>
    %c0_86 = arith.constant 0 : index
    %c0_87 = arith.constant 0 : index
    %164 = vector.load %arg7[%c0_86, %c0_87] : memref<8x32xf32, #tpu.memory_space<vmem>>, vector<8x32xf32>
    %165 = arith.mulf %155, %164 : vector<8x32xf32>
    %166 = arith.mulf %149, %157 : vector<8x32xf32>
    %167 = arith.addf %165, %166 : vector<8x32xf32>
    %168 = math.tanh %167 : vector<8x32xf32>
    %169 = arith.mulf %163, %168 : vector<8x32xf32>
    %c0_88 = arith.constant 0 : index
    %c0_89 = arith.constant 0 : index
    %170 = vector.load %arg7[%c0_88, %c0_89] : memref<8x32xf32, #tpu.memory_space<vmem>>, vector<8x32xf32>
    tpu.vector_store %arg7[%c0_88, %c0_89], %167 {strides = array<i32>} : memref<8x32xf32, #tpu.memory_space<vmem>>, vector<8x32xf32>,
    %c0_90 = arith.constant 0 : index
    %c0_91 = arith.constant 0 : index
    %171 = vector.load %arg6[%c0_90, %c0_91] : memref<8x32xf32, #tpu.memory_space<vmem>>, vector<8x32xf32>
    tpu.vector_store %arg6[%c0_90, %c0_91], %169 {strides = array<i32>} : memref<8x32xf32, #tpu.memory_space<vmem>>, vector<8x32xf32>,
    %c0_92 = arith.constant 0 : index
    %172 = arith.index_cast %135 : i32 to index
    %c0_93 = arith.constant 0 : index
    %c0_94 = arith.constant 0 : index
    %173 = vector.load %arg3[%c0_92, %172, %c0_93, %c0_94] : memref<1x8x8x32xf32, #tpu.memory_space<vmem>>, vector<1x1x8x32xf32>
    %174 = vector.shape_cast %173 : vector<1x1x8x32xf32> to vector<8x32xf32>
    %175 = vector.shape_cast %169 : vector<8x32xf32> to vector<1x1x8x32xf32>
    tpu.vector_store %arg3[%c0_92, %172, %c0_93, %c0_94], %175 {strides = array<i32>} : memref<1x8x8x32xf32, #tpu.memory_space<vmem>>, vector<1x1x8x32xf32>,
    %c4_i32 = arith.constant 4 : i32
    %c0_i32_95 = arith.constant 0 : i32
    %176 = arith.cmpi eq, %arg0, %c0_i32_95 : i32
    %c7_i32_96 = arith.constant 7 : i32
    %177 = arith.subi %c7_i32_96, %c4_i32 : i32
    %178 = arith.select %176, %c4_i32, %177 : i32
    %c0_97 = arith.constant 0 : index
    %179 = arith.index_cast %178 : i32 to index
    %c0_98 = arith.constant 0 : index
    %c0_99 = arith.constant 0 : index
    %180 = vector.load %arg1[%c0_97, %179, %c0_98, %c0_99] : memref<1x8x8x128xf32, #tpu.memory_space<vmem>>, vector<1x1x8x128xf32>
    %181 = vector.shape_cast %180 : vector<1x1x8x128xf32> to vector<8x128xf32>
    %c0_100 = arith.constant 0 : index
    %c0_101 = arith.constant 0 : index
    %182 = vector.load %arg6[%c0_100, %c0_101] : memref<8x32xf32, #tpu.memory_space<vmem>>, vector<8x32xf32>
    %c0_102 = arith.constant 0 : index
    %c0_103 = arith.constant 0 : index
    %c0_104 = arith.constant 0 : index
    %183 = vector.load %arg2[%c0_102, %c0_103, %c0_104] : memref<1x32x128xf32, #tpu.memory_space<vmem>>, vector<1x32x128xf32>
    %184 = vector.shape_cast %183 : vector<1x32x128xf32> to vector<32x128xf32>
    %cst_105 = arith.constant dense<0.000000e+00> : vector<8x128xf32>
    %185 = tpu.matmul %182, %184, %cst_105 {dimension_numbers = #tpu.dot_dimension_numbers<[1], [0], [0], [1], [0, 0, 1, 1], [], []>} : vector<8x32xf32>, vector<32x128xf32>, vector<8x128xf32> -> vector<8x128xf32>
    %186 = arith.addf %181, %185 : vector<8x128xf32>
    %187 = vector.extract_strided_slice %186 {offsets = [0, 0], sizes = [8, 32], strides = [1, 1]} : vector<8x128xf32> to vector<8x32xf32>
    %188 = arith.negf %187 : vector<8x32xf32>
    %189 = math.exp %188 : vector<8x32xf32>
    %cst_106 = arith.constant 1.000000e+00 : f32
    %190 = vector.broadcast %cst_106 : f32 to vector<8x32xf32>
    %191 = arith.addf %190, %189 : vector<8x32xf32>
    %192 = arith.divf %190, %191 : vector<8x32xf32>
    %193 = vector.extract_strided_slice %186 {offsets = [0, 32], sizes = [8, 32], strides = [1, 1]} : vector<8x128xf32> to vector<8x32xf32>
    %194 = arith.negf %193 : vector<8x32xf32>
    %195 = math.exp %194 : vector<8x32xf32>
    %cst_107 = arith.constant 1.000000e+00 : f32
    %196 = vector.broadcast %cst_107 : f32 to vector<8x32xf32>
    %197 = arith.addf %196, %195 : vector<8x32xf32>
    %198 = arith.divf %196, %197 : vector<8x32xf32>
    %199 = vector.extract_strided_slice %186 {offsets = [0, 64], sizes = [8, 32], strides = [1, 1]} : vector<8x128xf32> to vector<8x32xf32>
    %200 = math.tanh %199 : vector<8x32xf32>
    %201 = vector.extract_strided_slice %186 {offsets = [0, 96], sizes = [8, 32], strides = [1, 1]} : vector<8x128xf32> to vector<8x32xf32>
    %202 = arith.negf %201 : vector<8x32xf32>
    %203 = math.exp %202 : vector<8x32xf32>
    %cst_108 = arith.constant 1.000000e+00 : f32
    %204 = vector.broadcast %cst_108 : f32 to vector<8x32xf32>
    %205 = arith.addf %204, %203 : vector<8x32xf32>
    %206 = arith.divf %204, %205 : vector<8x32xf32>
    %c0_109 = arith.constant 0 : index
    %c0_110 = arith.constant 0 : index
    %207 = vector.load %arg7[%c0_109, %c0_110] : memref<8x32xf32, #tpu.memory_space<vmem>>, vector<8x32xf32>
    %208 = arith.mulf %198, %207 : vector<8x32xf32>
    %209 = arith.mulf %192, %200 : vector<8x32xf32>
    %210 = arith.addf %208, %209 : vector<8x32xf32>
    %211 = math.tanh %210 : vector<8x32xf32>
    %212 = arith.mulf %206, %211 : vector<8x32xf32>
    %c0_111 = arith.constant 0 : index
    %c0_112 = arith.constant 0 : index
    %213 = vector.load %arg7[%c0_111, %c0_112] : memref<8x32xf32, #tpu.memory_space<vmem>>, vector<8x32xf32>
    tpu.vector_store %arg7[%c0_111, %c0_112], %210 {strides = array<i32>} : memref<8x32xf32, #tpu.memory_space<vmem>>, vector<8x32xf32>,
    %c0_113 = arith.constant 0 : index
    %c0_114 = arith.constant 0 : index
    %214 = vector.load %arg6[%c0_113, %c0_114] : memref<8x32xf32, #tpu.memory_space<vmem>>, vector<8x32xf32>
    tpu.vector_store %arg6[%c0_113, %c0_114], %212 {strides = array<i32>} : memref<8x32xf32, #tpu.memory_space<vmem>>, vector<8x32xf32>,
    %c0_115 = arith.constant 0 : index
    %215 = arith.index_cast %178 : i32 to index
    %c0_116 = arith.constant 0 : index
    %c0_117 = arith.constant 0 : index
    %216 = vector.load %arg3[%c0_115, %215, %c0_116, %c0_117] : memref<1x8x8x32xf32, #tpu.memory_space<vmem>>, vector<1x1x8x32xf32>
    %217 = vector.shape_cast %216 : vector<1x1x8x32xf32> to vector<8x32xf32>
    %218 = vector.shape_cast %212 : vector<8x32xf32> to vector<1x1x8x32xf32>
    tpu.vector_store %arg3[%c0_115, %215, %c0_116, %c0_117], %218 {strides = array<i32>} : memref<1x8x8x32xf32, #tpu.memory_space<vmem>>, vector<1x1x8x32xf32>,
    %c5_i32 = arith.constant 5 : i32
    %c0_i32_118 = arith.constant 0 : i32
    %219 = arith.cmpi eq, %arg0, %c0_i32_118 : i32
    %c7_i32_119 = arith.constant 7 : i32
    %220 = arith.subi %c7_i32_119, %c5_i32 : i32
    %221 = arith.select %219, %c5_i32, %220 : i32
    %c0_120 = arith.constant 0 : index
    %222 = arith.index_cast %221 : i32 to index
    %c0_121 = arith.constant 0 : index
    %c0_122 = arith.constant 0 : index
    %223 = vector.load %arg1[%c0_120, %222, %c0_121, %c0_122] : memref<1x8x8x128xf32, #tpu.memory_space<vmem>>, vector<1x1x8x128xf32>
    %224 = vector.shape_cast %223 : vector<1x1x8x128xf32> to vector<8x128xf32>
    %c0_123 = arith.constant 0 : index
    %c0_124 = arith.constant 0 : index
    %225 = vector.load %arg6[%c0_123, %c0_124] : memref<8x32xf32, #tpu.memory_space<vmem>>, vector<8x32xf32>
    %c0_125 = arith.constant 0 : index
    %c0_126 = arith.constant 0 : index
    %c0_127 = arith.constant 0 : index
    %226 = vector.load %arg2[%c0_125, %c0_126, %c0_127] : memref<1x32x128xf32, #tpu.memory_space<vmem>>, vector<1x32x128xf32>
    %227 = vector.shape_cast %226 : vector<1x32x128xf32> to vector<32x128xf32>
    %cst_128 = arith.constant dense<0.000000e+00> : vector<8x128xf32>
    %228 = tpu.matmul %225, %227, %cst_128 {dimension_numbers = #tpu.dot_dimension_numbers<[1], [0], [0], [1], [0, 0, 1, 1], [], []>} : vector<8x32xf32>, vector<32x128xf32>, vector<8x128xf32> -> vector<8x128xf32>
    %229 = arith.addf %224, %228 : vector<8x128xf32>
    %230 = vector.extract_strided_slice %229 {offsets = [0, 0], sizes = [8, 32], strides = [1, 1]} : vector<8x128xf32> to vector<8x32xf32>
    %231 = arith.negf %230 : vector<8x32xf32>
    %232 = math.exp %231 : vector<8x32xf32>
    %cst_129 = arith.constant 1.000000e+00 : f32
    %233 = vector.broadcast %cst_129 : f32 to vector<8x32xf32>
    %234 = arith.addf %233, %232 : vector<8x32xf32>
    %235 = arith.divf %233, %234 : vector<8x32xf32>
    %236 = vector.extract_strided_slice %229 {offsets = [0, 32], sizes = [8, 32], strides = [1, 1]} : vector<8x128xf32> to vector<8x32xf32>
    %237 = arith.negf %236 : vector<8x32xf32>
    %238 = math.exp %237 : vector<8x32xf32>
    %cst_130 = arith.constant 1.000000e+00 : f32
    %239 = vector.broadcast %cst_130 : f32 to vector<8x32xf32>
    %240 = arith.addf %239, %238 : vector<8x32xf32>
    %241 = arith.divf %239, %240 : vector<8x32xf32>
    %242 = vector.extract_strided_slice %229 {offsets = [0, 64], sizes = [8, 32], strides = [1, 1]} : vector<8x128xf32> to vector<8x32xf32>
    %243 = math.tanh %242 : vector<8x32xf32>
    %244 = vector.extract_strided_slice %229 {offsets = [0, 96], sizes = [8, 32], strides = [1, 1]} : vector<8x128xf32> to vector<8x32xf32>
    %245 = arith.negf %244 : vector<8x32xf32>
    %246 = math.exp %245 : vector<8x32xf32>
    %cst_131 = arith.constant 1.000000e+00 : f32
    %247 = vector.broadcast %cst_131 : f32 to vector<8x32xf32>
    %248 = arith.addf %247, %246 : vector<8x32xf32>
    %249 = arith.divf %247, %248 : vector<8x32xf32>
    %c0_132 = arith.constant 0 : index
    %c0_133 = arith.constant 0 : index
    %250 = vector.load %arg7[%c0_132, %c0_133] : memref<8x32xf32, #tpu.memory_space<vmem>>, vector<8x32xf32>
    %251 = arith.mulf %241, %250 : vector<8x32xf32>
    %252 = arith.mulf %235, %243 : vector<8x32xf32>
    %253 = arith.addf %251, %252 : vector<8x32xf32>
    %254 = math.tanh %253 : vector<8x32xf32>
    %255 = arith.mulf %249, %254 : vector<8x32xf32>
    %c0_134 = arith.constant 0 : index
    %c0_135 = arith.constant 0 : index
    %256 = vector.load %arg7[%c0_134, %c0_135] : memref<8x32xf32, #tpu.memory_space<vmem>>, vector<8x32xf32>
    tpu.vector_store %arg7[%c0_134, %c0_135], %253 {strides = array<i32>} : memref<8x32xf32, #tpu.memory_space<vmem>>, vector<8x32xf32>,
    %c0_136 = arith.constant 0 : index
    %c0_137 = arith.constant 0 : index
    %257 = vector.load %arg6[%c0_136, %c0_137] : memref<8x32xf32, #tpu.memory_space<vmem>>, vector<8x32xf32>
    tpu.vector_store %arg6[%c0_136, %c0_137], %255 {strides = array<i32>} : memref<8x32xf32, #tpu.memory_space<vmem>>, vector<8x32xf32>,
    %c0_138 = arith.constant 0 : index
    %258 = arith.index_cast %221 : i32 to index
    %c0_139 = arith.constant 0 : index
    %c0_140 = arith.constant 0 : index
    %259 = vector.load %arg3[%c0_138, %258, %c0_139, %c0_140] : memref<1x8x8x32xf32, #tpu.memory_space<vmem>>, vector<1x1x8x32xf32>
    %260 = vector.shape_cast %259 : vector<1x1x8x32xf32> to vector<8x32xf32>
    %261 = vector.shape_cast %255 : vector<8x32xf32> to vector<1x1x8x32xf32>
    tpu.vector_store %arg3[%c0_138, %258, %c0_139, %c0_140], %261 {strides = array<i32>} : memref<1x8x8x32xf32, #tpu.memory_space<vmem>>, vector<1x1x8x32xf32>,
    %c6_i32 = arith.constant 6 : i32
    %c0_i32_141 = arith.constant 0 : i32
    %262 = arith.cmpi eq, %arg0, %c0_i32_141 : i32
    %c7_i32_142 = arith.constant 7 : i32
    %263 = arith.subi %c7_i32_142, %c6_i32 : i32
    %264 = arith.select %262, %c6_i32, %263 : i32
    %c0_143 = arith.constant 0 : index
    %265 = arith.index_cast %264 : i32 to index
    %c0_144 = arith.constant 0 : index
    %c0_145 = arith.constant 0 : index
    %266 = vector.load %arg1[%c0_143, %265, %c0_144, %c0_145] : memref<1x8x8x128xf32, #tpu.memory_space<vmem>>, vector<1x1x8x128xf32>
    %267 = vector.shape_cast %266 : vector<1x1x8x128xf32> to vector<8x128xf32>
    %c0_146 = arith.constant 0 : index
    %c0_147 = arith.constant 0 : index
    %268 = vector.load %arg6[%c0_146, %c0_147] : memref<8x32xf32, #tpu.memory_space<vmem>>, vector<8x32xf32>
    %c0_148 = arith.constant 0 : index
    %c0_149 = arith.constant 0 : index
    %c0_150 = arith.constant 0 : index
    %269 = vector.load %arg2[%c0_148, %c0_149, %c0_150] : memref<1x32x128xf32, #tpu.memory_space<vmem>>, vector<1x32x128xf32>
    %270 = vector.shape_cast %269 : vector<1x32x128xf32> to vector<32x128xf32>
    %cst_151 = arith.constant dense<0.000000e+00> : vector<8x128xf32>
    %271 = tpu.matmul %268, %270, %cst_151 {dimension_numbers = #tpu.dot_dimension_numbers<[1], [0], [0], [1], [0, 0, 1, 1], [], []>} : vector<8x32xf32>, vector<32x128xf32>, vector<8x128xf32> -> vector<8x128xf32>
    %272 = arith.addf %267, %271 : vector<8x128xf32>
    %273 = vector.extract_strided_slice %272 {offsets = [0, 0], sizes = [8, 32], strides = [1, 1]} : vector<8x128xf32> to vector<8x32xf32>
    %274 = arith.negf %273 : vector<8x32xf32>
    %275 = math.exp %274 : vector<8x32xf32>
    %cst_152 = arith.constant 1.000000e+00 : f32
    %276 = vector.broadcast %cst_152 : f32 to vector<8x32xf32>
    %277 = arith.addf %276, %275 : vector<8x32xf32>
    %278 = arith.divf %276, %277 : vector<8x32xf32>
    %279 = vector.extract_strided_slice %272 {offsets = [0, 32], sizes = [8, 32], strides = [1, 1]} : vector<8x128xf32> to vector<8x32xf32>
    %280 = arith.negf %279 : vector<8x32xf32>
    %281 = math.exp %280 : vector<8x32xf32>
    %cst_153 = arith.constant 1.000000e+00 : f32
    %282 = vector.broadcast %cst_153 : f32 to vector<8x32xf32>
    %283 = arith.addf %282, %281 : vector<8x32xf32>
    %284 = arith.divf %282, %283 : vector<8x32xf32>
    %285 = vector.extract_strided_slice %272 {offsets = [0, 64], sizes = [8, 32], strides = [1, 1]} : vector<8x128xf32> to vector<8x32xf32>
    %286 = math.tanh %285 : vector<8x32xf32>
    %287 = vector.extract_strided_slice %272 {offsets = [0, 96], sizes = [8, 32], strides = [1, 1]} : vector<8x128xf32> to vector<8x32xf32>
    %288 = arith.negf %287 : vector<8x32xf32>
    %289 = math.exp %288 : vector<8x32xf32>
    %cst_154 = arith.constant 1.000000e+00 : f32
    %290 = vector.broadcast %cst_154 : f32 to vector<8x32xf32>
    %291 = arith.addf %290, %289 : vector<8x32xf32>
    %292 = arith.divf %290, %291 : vector<8x32xf32>
    %c0_155 = arith.constant 0 : index
    %c0_156 = arith.constant 0 : index
    %293 = vector.load %arg7[%c0_155, %c0_156] : memref<8x32xf32, #tpu.memory_space<vmem>>, vector<8x32xf32>
    %294 = arith.mulf %284, %293 : vector<8x32xf32>
    %295 = arith.mulf %278, %286 : vector<8x32xf32>
    %296 = arith.addf %294, %295 : vector<8x32xf32>
    %297 = math.tanh %296 : vector<8x32xf32>
    %298 = arith.mulf %292, %297 : vector<8x32xf32>
    %c0_157 = arith.constant 0 : index
    %c0_158 = arith.constant 0 : index
    %299 = vector.load %arg7[%c0_157, %c0_158] : memref<8x32xf32, #tpu.memory_space<vmem>>, vector<8x32xf32>
    tpu.vector_store %arg7[%c0_157, %c0_158], %296 {strides = array<i32>} : memref<8x32xf32, #tpu.memory_space<vmem>>, vector<8x32xf32>,
    %c0_159 = arith.constant 0 : index
    %c0_160 = arith.constant 0 : index
    %300 = vector.load %arg6[%c0_159, %c0_160] : memref<8x32xf32, #tpu.memory_space<vmem>>, vector<8x32xf32>
    tpu.vector_store %arg6[%c0_159, %c0_160], %298 {strides = array<i32>} : memref<8x32xf32, #tpu.memory_space<vmem>>, vector<8x32xf32>,
    %c0_161 = arith.constant 0 : index
    %301 = arith.index_cast %264 : i32 to index
    %c0_162 = arith.constant 0 : index
    %c0_163 = arith.constant 0 : index
    %302 = vector.load %arg3[%c0_161, %301, %c0_162, %c0_163] : memref<1x8x8x32xf32, #tpu.memory_space<vmem>>, vector<1x1x8x32xf32>
    %303 = vector.shape_cast %302 : vector<1x1x8x32xf32> to vector<8x32xf32>
    %304 = vector.shape_cast %298 : vector<8x32xf32> to vector<1x1x8x32xf32>
    tpu.vector_store %arg3[%c0_161, %301, %c0_162, %c0_163], %304 {strides = array<i32>} : memref<1x8x8x32xf32, #tpu.memory_space<vmem>>, vector<1x1x8x32xf32>,
    %c7_i32_164 = arith.constant 7 : i32
    %c0_i32_165 = arith.constant 0 : i32
    %305 = arith.cmpi eq, %arg0, %c0_i32_165 : i32
    %c7_i32_166 = arith.constant 7 : i32
    %306 = arith.subi %c7_i32_166, %c7_i32_164 : i32
    %307 = arith.select %305, %c7_i32_164, %306 : i32
    %c0_167 = arith.constant 0 : index
    %308 = arith.index_cast %307 : i32 to index
    %c0_168 = arith.constant 0 : index
    %c0_169 = arith.constant 0 : index
    %309 = vector.load %arg1[%c0_167, %308, %c0_168, %c0_169] : memref<1x8x8x128xf32, #tpu.memory_space<vmem>>, vector<1x1x8x128xf32>
    %310 = vector.shape_cast %309 : vector<1x1x8x128xf32> to vector<8x128xf32>
    %c0_170 = arith.constant 0 : index
    %c0_171 = arith.constant 0 : index
    %311 = vector.load %arg6[%c0_170, %c0_171] : memref<8x32xf32, #tpu.memory_space<vmem>>, vector<8x32xf32>
    %c0_172 = arith.constant 0 : index
    %c0_173 = arith.constant 0 : index
    %c0_174 = arith.constant 0 : index
    %312 = vector.load %arg2[%c0_172, %c0_173, %c0_174] : memref<1x32x128xf32, #tpu.memory_space<vmem>>, vector<1x32x128xf32>
    %313 = vector.shape_cast %312 : vector<1x32x128xf32> to vector<32x128xf32>
    %cst_175 = arith.constant dense<0.000000e+00> : vector<8x128xf32>
    %314 = tpu.matmul %311, %313, %cst_175 {dimension_numbers = #tpu.dot_dimension_numbers<[1], [0], [0], [1], [0, 0, 1, 1], [], []>} : vector<8x32xf32>, vector<32x128xf32>, vector<8x128xf32> -> vector<8x128xf32>
    %315 = arith.addf %310, %314 : vector<8x128xf32>
    %316 = vector.extract_strided_slice %315 {offsets = [0, 0], sizes = [8, 32], strides = [1, 1]} : vector<8x128xf32> to vector<8x32xf32>
    %317 = arith.negf %316 : vector<8x32xf32>
    %318 = math.exp %317 : vector<8x32xf32>
    %cst_176 = arith.constant 1.000000e+00 : f32
    %319 = vector.broadcast %cst_176 : f32 to vector<8x32xf32>
    %320 = arith.addf %319, %318 : vector<8x32xf32>
    %321 = arith.divf %319, %320 : vector<8x32xf32>
    %322 = vector.extract_strided_slice %315 {offsets = [0, 32], sizes = [8, 32], strides = [1, 1]} : vector<8x128xf32> to vector<8x32xf32>
    %323 = arith.negf %322 : vector<8x32xf32>
    %324 = math.exp %323 : vector<8x32xf32>
    %cst_177 = arith.constant 1.000000e+00 : f32
    %325 = vector.broadcast %cst_177 : f32 to vector<8x32xf32>
    %326 = arith.addf %325, %324 : vector<8x32xf32>
    %327 = arith.divf %325, %326 : vector<8x32xf32>
    %328 = vector.extract_strided_slice %315 {offsets = [0, 64], sizes = [8, 32], strides = [1, 1]} : vector<8x128xf32> to vector<8x32xf32>
    %329 = math.tanh %328 : vector<8x32xf32>
    %330 = vector.extract_strided_slice %315 {offsets = [0, 96], sizes = [8, 32], strides = [1, 1]} : vector<8x128xf32> to vector<8x32xf32>
    %331 = arith.negf %330 : vector<8x32xf32>
    %332 = math.exp %331 : vector<8x32xf32>
    %cst_178 = arith.constant 1.000000e+00 : f32
    %333 = vector.broadcast %cst_178 : f32 to vector<8x32xf32>
    %334 = arith.addf %333, %332 : vector<8x32xf32>
    %335 = arith.divf %333, %334 : vector<8x32xf32>
    %c0_179 = arith.constant 0 : index
    %c0_180 = arith.constant 0 : index
    %336 = vector.load %arg7[%c0_179, %c0_180] : memref<8x32xf32, #tpu.memory_space<vmem>>, vector<8x32xf32>
    %337 = arith.mulf %327, %336 : vector<8x32xf32>
    %338 = arith.mulf %321, %329 : vector<8x32xf32>
    %339 = arith.addf %337, %338 : vector<8x32xf32>
    %340 = math.tanh %339 : vector<8x32xf32>
    %341 = arith.mulf %335, %340 : vector<8x32xf32>
    %c0_181 = arith.constant 0 : index
    %c0_182 = arith.constant 0 : index
    %342 = vector.load %arg7[%c0_181, %c0_182] : memref<8x32xf32, #tpu.memory_space<vmem>>, vector<8x32xf32>
    tpu.vector_store %arg7[%c0_181, %c0_182], %339 {strides = array<i32>} : memref<8x32xf32, #tpu.memory_space<vmem>>, vector<8x32xf32>,
    %c0_183 = arith.constant 0 : index
    %c0_184 = arith.constant 0 : index
    %343 = vector.load %arg6[%c0_183, %c0_184] : memref<8x32xf32, #tpu.memory_space<vmem>>, vector<8x32xf32>
    tpu.vector_store %arg6[%c0_183, %c0_184], %341 {strides = array<i32>} : memref<8x32xf32, #tpu.memory_space<vmem>>, vector<8x32xf32>,
    %c0_185 = arith.constant 0 : index
    %344 = arith.index_cast %307 : i32 to index
    %c0_186 = arith.constant 0 : index
    %c0_187 = arith.constant 0 : index
    %345 = vector.load %arg3[%c0_185, %344, %c0_186, %c0_187] : memref<1x8x8x32xf32, #tpu.memory_space<vmem>>, vector<1x1x8x32xf32>
    %346 = vector.shape_cast %345 : vector<1x1x8x32xf32> to vector<8x32xf32>
    %347 = vector.shape_cast %341 : vector<8x32xf32> to vector<1x1x8x32xf32>
    tpu.vector_store %arg3[%c0_185, %344, %c0_186, %c0_187], %347 {strides = array<i32>} : memref<1x8x8x32xf32, #tpu.memory_space<vmem>>, vector<1x1x8x32xf32>,
    %c8_i32 = arith.constant 8 : i32
    %c0_188 = arith.constant 0 : index
    %c0_189 = arith.constant 0 : index
    %348 = vector.load %arg6[%c0_188, %c0_189] : memref<8x32xf32, #tpu.memory_space<vmem>>, vector<8x32xf32>
    %c0_190 = arith.constant 0 : index
    %c0_191 = arith.constant 0 : index
    %c0_192 = arith.constant 0 : index
    %349 = vector.load %arg4[%c0_190, %c0_191, %c0_192] : memref<1x8x32xf32, #tpu.memory_space<vmem>>, vector<1x8x32xf32>
    %350 = vector.shape_cast %349 : vector<1x8x32xf32> to vector<8x32xf32>
    %351 = vector.shape_cast %348 : vector<8x32xf32> to vector<1x8x32xf32>
    tpu.vector_store %arg4[%c0_190, %c0_191, %c0_192], %351 {strides = array<i32>} : memref<1x8x32xf32, #tpu.memory_space<vmem>>, vector<1x8x32xf32>,
    %c0_193 = arith.constant 0 : index
    %c0_194 = arith.constant 0 : index
    %352 = vector.load %arg7[%c0_193, %c0_194] : memref<8x32xf32, #tpu.memory_space<vmem>>, vector<8x32xf32>
    %c0_195 = arith.constant 0 : index
    %c0_196 = arith.constant 0 : index
    %c0_197 = arith.constant 0 : index
    %353 = vector.load %arg5[%c0_195, %c0_196, %c0_197] : memref<1x8x32xf32, #tpu.memory_space<vmem>>, vector<1x8x32xf32>
    %354 = vector.shape_cast %353 : vector<1x8x32xf32> to vector<8x32xf32>
    %355 = vector.shape_cast %352 : vector<8x32xf32> to vector<1x8x32xf32>
    tpu.vector_store %arg5[%c0_195, %c0_196, %c0_197], %355 {strides = array<i32>} : memref<1x8x32xf32, #tpu.memory_space<vmem>>, vector<1x8x32xf32>,
    return
  }
  func.func @transform_0(%arg0: i32) -> (i32, i32, i32, i32) {
    %c0_i32 = arith.constant 0 : i32
    %c0_i32_0 = arith.constant 0 : i32
    %c0_i32_1 = arith.constant 0 : i32
    %c0_i32_2 = arith.constant 0 : i32
    return %arg0, %c0_i32, %c0_i32_0, %c0_i32_1 : i32, i32, i32, i32
  }
  func.func @transform_1(%arg0: i32) -> (i32, i32, i32) {
    %c0_i32 = arith.constant 0 : i32
    %c0_i32_0 = arith.constant 0 : i32
    %c0_i32_1 = arith.constant 0 : i32
    return %arg0, %c0_i32, %c0_i32_0 : i32, i32, i32
  }
  func.func @transform_2(%arg0: i32) -> (i32, i32, i32, i32) {
    %c0_i32 = arith.constant 0 : i32
    %c0_i32_0 = arith.constant 0 : i32
    %c0_i32_1 = arith.constant 0 : i32
    %c0_i32_2 = arith.constant 0 : i32
    return %arg0, %c0_i32, %c0_i32_0, %c0_i32_1 : i32, i32, i32, i32
  }
  func.func @transform_3(%arg0: i32) -> (i32, i32, i32) {
    %c0_i32 = arith.constant 0 : i32
    %c0_i32_0 = arith.constant 0 : i32
    %c0_i32_1 = arith.constant 0 : i32
    return %arg0, %c0_i32, %c0_i32_0 : i32, i32, i32
  }
  func.func @transform_4(%arg0: i32) -> (i32, i32, i32) {
    %c0_i32 = arith.constant 0 : i32
    %c0_i32_0 = arith.constant 0 : i32
    %c0_i32_1 = arith.constant 0 : i32
    return %arg0, %c0_i32, %c0_i32_0 : i32, i32, i32
  }
}

</mosaic_0001>

<bundles_post_ra>
// kernel: tpu_custom_call.1
= control target key start
LH: loop header
LB: loop body
LE: loop exit
PB: predicated region body
PF: predicated region fallthrough
CT: control target
= control target key end

     0   :  { %s2606_s0 = inlined_call_operand.hbm [shape: f32[2,8,8,128], index: 0, kind: input, shape index: {}]   ;;  %s2607_s1 = inlined_call_operand.hbm [shape: f32[2,32,128], index: 1, kind: input, shape index: {}]   ;;  %s2608_s2 = inlined_call_operand.hbm [shape: f32[2,8,8,32], index: 2, kind: output, shape index: {0}]   ;;  %s2609_s3 = inlined_call_operand.hbm [shape: f32[2,8,32], index: 3, kind: output, shape index: {1}]   ;;  %s2610_s4 = inlined_call_operand.hbm [shape: f32[2,8,32], index: 4, kind: output, shape index: {2}]  }
   0x1   :  { %2615 = sst [smem:[#allocation17_spill]] %s2606_s0 }
   0x2   :  { %10 = vsyncpa [#allocation5], 0 }
   0x3   :  { %12 = vsyncpa [#allocation5 + $0x1], 0 }
   0x4   :  { %13 = vsyncpa [#allocation8], 0 }
   0x5   :  { %15 = vsyncpa [#allocation8 + $0x1], 0 }
   0x6   :  { %16 = vsyncpa [#allocation6], 0 }
   0x7   :  { %18 = vsyncpa [#allocation6 + $0x1], 0 }
   0x8   :  { %19 = vsyncpa [#allocation11], 0 }
   0x9   :  { %21 = vsyncpa [#allocation11 + $0x1], 0  ;;  %s2047_s15 = smov 0   ;;  %s2049_s16 = smov 0  }
   0xa   :  { %s2051_s17 = smov 0   ;;  %s2053_s18 = smov 0  }
   0xb LB: > { %s2068_s19 = sadd.s32 4294967295, %s2006_s18   ;;  %s2613_s20 = sadd.s32 4294967294, %s2006_s18   ;;  %s2006_s18 = sphi %s2053_s18, %s2639_s18   ;;  %s2002_s17 = sphi %s2051_s17, %s2638_s17   ;;  %s1998_s16 = sphi %s2049_s16, %s2637_s16   ;;  %s1994_s15 = sphi %s2047_s15, %s2636_s15  }
   0xc   : > { %s2072_s21 = sadd.s32 1, %s2006_s18   ;;  %s34_s22 = sadd.s32 1, %s2002_s17 }
   0xd   : > { %s31_s23 = ssub.s32 %s2006_s18, %s2072_s21  ;;  %p41_p0 = scmp.ne.s32.totalorder %s2002_s17, %s1998_s16 }
   0xe   : > { %p32_p1 = scmp.eq.s32.totalorder %s31_s23, 0  ;;  %p42_p2 = scmp.eq.s32.totalorder %s2006_s18, 0 }
   0xf   : > { %p47_p3 = scmp.ne.s32.totalorder %s1998_s16, %s1994_s15  ;;  %p2611_p4 = scmp.eq.s32.totalorder %s2068_s19, 0 }
  0x10   : > { %s2084_s24 = scalar_select %p32_p1, %s2002_s17, %s34_s22  }
  0x11   : > { %p2086_p5 = por %p42_p2, %p41_p0  ;;  %p2092_p6 = por %p2611_p4, %p47_p3 }
  0x12   : > { %p97_p7 = scmp.eq.s32.totalorder %s2068_s19, 1  ;;  %p103_p8 = scmp.eq.s32.totalorder %s2613_s20, 1 }
  0x13   : > { %s2617_s26 = scalar_select %p2092_p6, 1, 0 }
  0x14   : > { %p1719_p10 = scmp.lt.s32.totalorder %s2006_s18, 2  ;;  %p2101_p11 = por %p97_p7, %p41_p0 }
  0x15   : > { %p2105_p12 = por %p103_p8, %p47_p3  ;;  %s2110_s29 = sand.u32 1, %s2002_s17  }
  0x16   : > { %s2618_s27 = scalar_select %p2101_p11, 1, 0 }
  0x17   : > { %s2619_s28 = scalar_select %p2105_p12, 1, 0 }
  0x18   : > { %s1561_s30 = sshll.u32 %s2006_s18, 10  ;;  %s1516_s5 = sshll.u32 %s2110_s29, 6 }
  0x19   : > { %s2620_s0 = sld [smem:[#allocation17_spill]]  ;;  %s179_s9 = scalar_lea.vmem [#allocation4], %s1516_s5 }
  0x1a   : > { %s186_s10 = sshll.u32 %s179_s9, 4  ;;  %p2121_p13 = pnand %p1719_p10, %p2086_p5  ;;  %s2125_s10 = int_to_ptr.vmem [resolvable:$true] %s186_s10 }
  0x1b   : > { %s176_s12 = scalar_lea.sflag [#allocation5], %s2110_s29 }
  0x1c   : > { %p1828_p1 = pneg %p2121_p13 }
  0x1f   : > { %s2117_s8 = scalar_lea.hbm %s2620_s0, %s1561_s30  ;;  %s1831_s23 = scalar_lea.hbm %s2620_s0, 2048 }
  0x20   : > { %s1826_s13 = scalar_lea.hbm %s2117_s8, 1024  ;;  %p1832_p5 = scmp.lt.s32.totalorder %s2117_s8, %s2620_s0 }
  0x21   : > { %p1827_p0 = scmp.ne.s32.totalorder %s2117_s8, %s1826_s13  ;;  %p1833_p7 = scmp.lt.s32.totalorder %s1831_s23, %s1826_s13 }
  0x23   : > { %p1829_p2 = pnand %p1828_p1, %p1827_p0  ;;  %p1834_p8 = por %p1833_p7, %p1832_p5 }
  0x25   : > { %p1830_p3 = pneg %p1829_p2 }
  0x27   : > { %p1835_p10 = pnand %p1834_p8, %p1830_p3 }
  0x29   : > { %1838 = shalt.err (!%p1835_p10)
}
  0x2a   : > { %s1839_s5 = scalar_lea.vmem %s2125_s10, 1024  ;;  %s2008_s6 = smov [#allocation4]  }
  0x2b   : > { %p1840_p9 = scmp.ne.s32.totalorder %s2125_s10, %s1839_s5  ;;  %s1844_s7 = sshll.u32 %s2008_s6, 4  ;;  %s1845_s7 = int_to_ptr.vmem [resolvable:$false] %s1844_s7 }
  0x2c   : > { %s1846_s9 = scalar_lea.vmem %s1845_s7, 2048  ;;  %p1847_p4 = scmp.lt.s32.totalorder %s2125_s10, %s1845_s7 }
  0x2d   : > { %p1842_p0 = pnand %p1840_p9, %p1828_p1  ;;  %p1848_p12 = scmp.lt.s32.totalorder %s1846_s9, %s1839_s5 }
  0x2f   : > { %p1843_p2 = pneg %p1842_p0  ;;  %p1849_p11 = por %p1848_p12, %p1847_p4 }
  0x31   : > { %p1850_p5 = pnand %p1849_p11, %p1843_p2 }
  0x33   : > { %1853 = shalt.err (!%p1850_p5)
}
  0x34   : > { %s2009_s13 = smov 128   ;;  %s2010_s14 = smov 8  }
  0x35   : > { %1705 = dma.hbm_to_vmem [thread:$0]  (!%p2121_p13), %s2117_s8, 1024, %s2125_s10, %s176_s12, %s2009_s13, %s2009_s13, %s2010_s14  }
  0x36   : > { %p1522_p4 = scmp.ge.s32.totalorder %s2006_s18, 1  ;;  %p215_p9 = scmp.lt.s32.totalorder %s2006_s18, 3 }
  0x37   : > { %s1519_s22 = sshll.u32 %s2110_s29, 5  ;;  %s1562_s25 = sshll.u32 %s2006_s18, 9 }
  0x38   : > { %p2160_p11 = pnand %p1522_p4, %p215_p9  ;;  %s200_s30 = scalar_lea.vmem [#allocation7], %s1519_s22 }
  0x39   : > { %s207_s5 = sshll.u32 %s200_s30, 4  ;;  %s2168_s9 = scalar_lea.hbm %s2607_s1, %s1562_s25  ;;  %s2170_s5 = int_to_ptr.vmem [resolvable:$true] %s207_s5 }
  0x3a   : > { %s197_s8 = scalar_lea.sflag [#allocation8], %s2110_s29  ;;  %s1854_s10 = scalar_lea.hbm %s2168_s9, 512 }
  0x3b   : > { %p1855_p12 = scmp.ne.s32.totalorder %s2168_s9, %s1854_s10  ;;  %s1859_s30 = scalar_lea.hbm %s2607_s1, 1024 }
  0x3c   : > { %p1860_p8 = scmp.lt.s32.totalorder %s2168_s9, %s2607_s1  ;;  %p1861_p10 = scmp.lt.s32.totalorder %s1859_s30, %s1854_s10 }
  0x3d   : > { %p1857_p3 = pnand %p1855_p12, %p1828_p1 }
  0x3e   : > { %p1862_p0 = por %p1861_p10, %p1860_p8 }
  0x3f   : > { %p1858_p7 = pneg %p1857_p3 }
  0x41   : > { %p1863_p2 = pnand %p1862_p0, %p1858_p7 }
  0x43   : > { %1866 = shalt.err (!%p1863_p2)
}
  0x44   : > { %s1867_s29 = scalar_lea.vmem %s2170_s5, 512  ;;  %s2011_s25 = smov [#allocation7]  }
  0x45   : > { %p1868_p5 = scmp.ne.s32.totalorder %s2170_s5, %s1867_s29  ;;  %s1872_s7 = sshll.u32 %s2011_s25, 4  ;;  %s1873_s7 = int_to_ptr.vmem [resolvable:$false] %s1872_s7 }
  0x46   : > { %s1874_s12 = scalar_lea.vmem %s1873_s7, 1024  ;;  %p1875_p12 = scmp.lt.s32.totalorder %s2170_s5, %s1873_s7 }
  0x47   : > { %p1870_p4 = pnand %p1868_p5, %p1828_p1  ;;  %p1876_p3 = scmp.lt.s32.totalorder %s1874_s12, %s1867_s29 }
  0x49   : > { %p1871_p9 = pneg %p1870_p4  ;;  %p1877_p6 = por %p1876_p3, %p1875_p12 }
  0x4b   : > { %p1878_p8 = pnand %p1877_p6, %p1871_p9 }
  0x4d   : > { %1881 = shalt.err (!%p1878_p8)
}
  0x4e   : > { %1708 = dma.hbm_to_vmem [thread:$0]  (!%p2121_p13), %s2168_s9, 512, %s2170_s5, %s197_s8, %s2009_s13, %s2009_s13, %s2010_s14  }
  0x4f   : > { %219 = sbr.rel (%p2160_p11) target bundleno = 5726 (0x165e), region = 28  ;;  %s2201_s20 = sand.u32 (!%p2160_p11), 1, %s1998_s16  }
  0x50   : > { %s1523_s10 = sshll.u32 (!%p2160_p11), %s2201_s20, 6  ;;  %s222_s22 = scalar_lea.sflag (!%p2160_p11), [#allocation5], %s2201_s20 }
  0x51   : > { %s2207_s11 = scalar_lea.vmem (!%p2160_p11), [#allocation4], %s1523_s10  ;;  %p2623_p6 = scmp.ne.s32.totalorder (!%p2160_p11), %s2617_s26, 0 }
  0x54   : > { %1977 = dma.done.wait (%p2623_p6), %s222_s22, 1024  }
  0x55   : > { %1979 = vsyncadd (%p2623_p6), %s222_s22, 4294966272  ;;  %s1524_s13 = sshll.u32 %s2201_s20, 5  ;;  %s231_s14 = scalar_lea.sflag [#allocation8], %s2201_s20 }
  0x56   : > { %s234_s23 = scalar_lea.vmem [#allocation7], %s1524_s13 }
  0x57   : > { %1981 = dma.done.wait (%p2623_p6), %s231_s14, 512  }
  0x58   : > { %1983 = vsyncadd (%p2623_p6), %s231_s14, 4294966784  ;;  %vm274_vm0 = vcmask 261120   ;;  %v2012_v0 = vmov 0.0   ;;  %vm2013_vm1 = vmmov 0   ;;  %v2229_v1 = vld [vmem:[%s234_s23 + $0x18] sm:$0xff]  ;;  %v2231_v2 = vld [vmem:[%s234_s23 + $0x10] sm:$0xff] }
  0x59   : > { %1604 = vmatprep.subr.mxu0 %v2012_v0  ;;  %1612 = vmatprep.mubr.msk.f32.mxu0 %vm2013_vm1, %v2012_v0  ;;  %275 = vst.msk [vmem:[#allocation2] sm:$0xff] %vm274_vm0, %v2012_v0  ;;  %276 = vst.msk [vmem:[#allocation3] sm:$0xff] %vm274_vm0, %v2012_v0  ;;  %v2236_v3 = vld [vmem:[%s234_s23 + $0x8] sm:$0xff]  ;;  %v2242_v4 = vld [vmem:[%s234_s23] sm:$0xff]  ;;  %p2624_p13 = scmp.eq.s32.totalorder %s2068_s19, 0  ;;  %s2014_s8 = smov 64  }
  0x5a   : > { %1615 = vmatprep.subr.mxu1 %v2012_v0  ;;  %1623 = vmatprep.mubr.msk.f32.mxu1 %vm2013_vm1, %v2012_v0  ;;  %s2015_s30 = smov 32   ;;  %s2016_s6 = smov 96  }
  0x5b   : > { %1605 = vmatpush3.msra.mxu0 %v2229_v1  ;;  %1616 = vmatpush3.msra.mxu1 %v2229_v1  ;;  %s2266_s26 = scalar_select %p2624_p13, 0, 7 }
  0x5c   : > { %1606 = vmatprep.subr.mxu0 %v2012_v0  ;;  %1617 = vmatprep.subr.mxu1 %v2012_v0  ;;  %s2282_s29 = scalar_lea.vmem [#allocation9], %s1523_s10  ;;  %p2625_p1 = pmov %p2624_p13 }
  0x5d   : > { %1607 = vmatpush3.msra.mxu0 %v2231_v2  ;;  %1618 = vmatpush3.msra.mxu1 %v2231_v2  ;;  %s1528_s5 = sshll.u32 %s2266_s26, 3  ;;  %p2632_p9 = scmp.ne.s32.totalorder %s2618_s27, 0 }
  0x5e   : > { %1608 = vmatprep.subr.mxu0 %v2012_v0  ;;  %1619 = vmatprep.subr.mxu1 %v2012_v0  ;;  %s280_s9 = scalar_lea.vmem %s2207_s11, %s1528_s5 [#allocation4]  ;;  %s400_s25 = scalar_lea.vmem %s2282_s29, %s1528_s5 [#allocation9] }
  0x5f   : > { %1609 = vmatpush3.msra.mxu0 %v2236_v3  ;;  %1620 = vmatpush3.msra.mxu1 %v2236_v3  ;;  %v281_v6 = vld [vmem:[%s280_s9] sm:$0xff]  ;;  %s2302_s7 = scalar_select %p2625_p1, 1, 6 }
  0x60   : > { %v282_v5 = vld [vmem:[#allocation2] sm:$0xff]  ;;  %1610 = vmatprep.subr.mxu0 %v2012_v0  ;;  %1621 = vmatprep.subr.mxu1 %v2012_v0  ;;  %v368_v11 = vld [vmem:[#allocation3] sm:$0xff]  ;;  %p2626_p11 = pmov %p2625_p1  ;;  %p2627_p7 = pmov %p2625_p1 }
  0x61   : > { %1611 = vmatpush3.msra.mxu0 %v2242_v4  ;;  %1622 = vmatpush3.msra.mxu1 %v2242_v4  ;;  %s1531_s12 = sshll.u32 %s2302_s7, 3  ;;  %p2628_p10 = pmov %p2625_p1 }
  0x62   : > { %1613 = vmatmul.mubr.msk.f32.vlgmr.msra.gmra.mxu0 %vm274_vm0, %v282_v5  ;;  %1626 = vmatprep.subr.mxu0 %v2012_v0  ;;  %s404_s10 = scalar_lea.vmem %s2207_s11, %s1531_s12 [#allocation4]  ;;  %s524_s22 = scalar_lea.vmem %s2282_s29, %s1531_s12 [#allocation9] }
  0x63   : > { %1627 = vmatpush3.msra.mxu0 %v2229_v1  ;;  %1634 = vmatprep.mubr.msk.f32.mxu0 %vm2013_vm1, %v2012_v0  ;;  %v405_v29 = vld [vmem:[%s404_s10] sm:$0xff]  ;;  %s2333_s13 = scalar_select %p2626_p11, 2, 5 }
  0x64   : > { %1628 = vmatprep.subr.mxu0 %v2012_v0  ;;  %1637 = vmatprep.subr.mxu1 %v2012_v0  ;;  %s2364_s5 = scalar_select %p2627_p7, 3, 4 }
  0x65   : > { %1629 = vmatpush3.msra.mxu0 %v2231_v2  ;;  %s1534_s14 = sshll.u32 %s2333_s13, 3  ;;  %p2629_p0 = pmov %p2625_p1 }
  0x66   : > { %1630 = vmatprep.subr.mxu0 %v2012_v0  ;;  %s528_s23 = scalar_lea.vmem %s2207_s11, %s1534_s14 [#allocation4]  ;;  %s648_s26 = scalar_lea.vmem %s2282_s29, %s1534_s14 [#allocation9] }
  0x67   : > { %1631 = vmatpush3.msra.mxu0 %v2236_v3  ;;  %v529_v51 = vld [vmem:[%s528_s23] sm:$0xff]  ;;  %s1537_s9 = sshll.u32 %s2364_s5, 3  ;;  %p2630_p2 = pmov %p2629_p0 }
  0x68   : > { %1632 = vmatprep.subr.mxu0 %v2012_v0  ;;  %s772_s7 = scalar_lea.vmem %s2282_s29, %s1537_s9 [#allocation9]  ;;  %p2631_p5 = pmov %p2629_p0 }
  0x69   : > { %1633 = vmatpush3.msra.mxu0 %v2242_v4  ;;  %s2394_s12 = scalar_select %p2628_p10, 4, 3 }
  0x6a   : > { %1648 = vmatprep.subr.mxu0 %v2012_v0  ;;  %s2424_s14 = scalar_select %p2629_p0, 5, 2 }
  0x6b   : > { %s1540_s10 = sshll.u32 %s2394_s12, 3 }
  0x6c   : > { %s896_s13 = scalar_lea.vmem %s2282_s29, %s1540_s10 [#allocation9]  ;;  %s1543_s23 = sshll.u32 %s2424_s14, 3 }
  0x6d   : > { %s1020_s5 = scalar_lea.vmem %s2282_s29, %s1543_s23 [#allocation9] }
 0x122   : > { %v356_v7 = vpop.f32.mrf.mxu0 }
 0x123   : > { %v360_v8 = vadd.f32 %v356_v7, %v281_v6 }
 0x124   : > { %v1614_v9 = vpop.f32.mrf.mxu0 }
 0x125   : > { %1762 = vtanh.f32 %v360_v8  ;;  %v1530_v12 = vmul.f32 -1.442695, %v360_v8 }
 0x127   : > { %1764 = vpow2.f32 %v1530_v12 }
 0x132   : > { %v1763_v10 = vpop.eup %1762 }
 0x133   : > { %375 = vrot.lane.b32.xlu0 %v1763_v10, %s2014_s8 }
 0x134   : > { %v1765_v13 = vpop.eup %1764 }
 0x135   : > { %v364_v14 = vadd.f32 1.0, %v1765_v13 }
 0x137   : > { %370 = vrot.lane.b32.xlu0 %v368_v11, %s2015_s30  ;;  %1766 = vrcp.f32 %v364_v14 }
 0x144   : > { %v1767_v15 = vpop.eup %1766 }
 0x1a5   : > { %v376_v16 = vpop.permute.xlu0 %375 }
 0x1a6   : > { %v378_v17 = vmul.f32 %v1767_v15, %v376_v16 }
 0x1a8   : > { %380 = vrot.lane.b32.xlu1 %v378_v17, %s2015_s30 }
 0x1a9   : > { %v371_v18 = vpop.permute.xlu0 %370 }
 0x1aa   : > { %v373_v19 = vmul.f32 %v1767_v15, %v371_v18 }
 0x21a   : > { %v381_v20 = vpop.permute.xlu1 %380 }
 0x21b   : > { %v383_v21 = vadd.f32 %v381_v20, %v373_v19 }
 0x21d   : > { %1768 = vtanh.f32 %v383_v21 }
 0x22a   : > { %v1769_v22 = vpop.eup %1768 }
 0x22b   : > { %386 = vrot.lane.b32.xlu1 %v1769_v22, %s2014_s8 }
 0x22f   : > { %391 = vrot.lane.b32.xlu1 %v383_v21, %s2016_s6 }
 0x29d   : > { %v387_v23 = vpop.permute.xlu1 %386 }
 0x29e   : > { %v389_v24 = vmul.f32 %v1767_v15, %v387_v23 }
 0x2a0   : > { %396 = vrot.lane.b32.xlu0 %v389_v24, %s2015_s30 }
 0x2a1   : > { %v392_v25 = vpop.permute.xlu1 %391 }
 0x2a2   : > { %394 = vst.msk [vmem:[#allocation3] sm:$0xff] %vm274_vm0, %v392_v25 }
 0x2a9   : > { %v492_v26 = vld [vmem:[#allocation3] sm:$0xff] }
 0x2aa   : > { %494 = vrot.lane.b32.xlu1 %v492_v26, %s2015_s30 }
 0x312   : > { %v397_v27 = vpop.permute.xlu0 %396 }
 0x313   : > { %399 = vst.msk [vmem:[#allocation2] sm:$0xff] %vm274_vm0, %v397_v27  ;;  %401 = vst.msk [vmem:[%s400_s25] sm:$0xff] %vm274_vm0, %v397_v27  ;;  %s652_s25 = scalar_lea.vmem %s2207_s11, %s1537_s9 [#allocation4] }
 0x314   : > { %v653_v14 = vld [vmem:[%s652_s25] sm:$0xff]  ;;  %s2445_s9 = scalar_select %p2630_p2, 6, 1 }
 0x316   : > { %s1546_s25 = sshll.u32 %s2445_s9, 3  ;;  %s1275_s9 = scalar_lea.sflag [#allocation6], %s2201_s20 }
 0x317   : > { %s1144_s12 = scalar_lea.vmem %s2282_s29, %s1546_s25 [#allocation9] }
 0x31a   : > { %v406_v28 = vld [vmem:[#allocation2] sm:$0xff] }
 0x31b   : > { %1624 = vmatmul.mubr.msk.f32.vlgmr.msra.gmra.mxu1 %vm274_vm0, %v406_v28 }
 0x31c   : > { %1638 = vmatpush3.msra.mxu1 %v2229_v1  ;;  %1645 = vmatprep.mubr.msk.f32.mxu1 %vm2013_vm1, %v2012_v0  ;;  %v495_v40 = vpop.permute.xlu1 %494 }
 0x31d   : > { %1639 = vmatprep.subr.mxu1 %v2012_v0 }
 0x31e   : > { %1640 = vmatpush3.msra.mxu1 %v2231_v2 }
 0x31f   : > { %1641 = vmatprep.subr.mxu1 %v2012_v0 }
 0x320   : > { %1642 = vmatpush3.msra.mxu1 %v2236_v3 }
 0x321   : > { %1643 = vmatprep.subr.mxu1 %v2012_v0 }
 0x322   : > { %1644 = vmatpush3.msra.mxu1 %v2242_v4 }
 0x323   : > { %1659 = vmatprep.subr.mxu1 %v2012_v0 }
 0x3db   : > { %v480_v30 = vpop.f32.mrf.mxu1 }
 0x3dc   : > { %v484_v31 = vadd.f32 %v480_v30, %v405_v29 }
 0x3dd   : > { %v1625_v32 = vpop.f32.mrf.mxu1 }
 0x3de   : > { %1770 = vtanh.f32 %v484_v31  ;;  %v1533_v34 = vmul.f32 -1.442695, %v484_v31 }
 0x3e0   : > { %1772 = vpow2.f32 %v1533_v34 }
 0x3eb   : > { %v1771_v33 = vpop.eup %1770 }
 0x3ec   : > { %499 = vrot.lane.b32.xlu0 %v1771_v33, %s2014_s8 }
 0x3ed   : > { %v1773_v35 = vpop.eup %1772 }
 0x3ee   : > { %v488_v36 = vadd.f32 1.0, %v1773_v35 }
 0x3f0   : > { %1774 = vrcp.f32 %v488_v36 }
 0x3fd   : > { %v1775_v37 = vpop.eup %1774 }
 0x3fe   : > { %v497_v41 = vmul.f32 %v1775_v37, %v495_v40 }
 0x45e   : > { %v500_v38 = vpop.permute.xlu0 %499 }
 0x45f   : > { %v502_v39 = vmul.f32 %v1775_v37, %v500_v38 }
 0x461   : > { %504 = vrot.lane.b32.xlu0 %v502_v39, %s2015_s30 }
 0x4d3   : > { %v505_v42 = vpop.permute.xlu0 %504 }
 0x4d4   : > { %v507_v43 = vadd.f32 %v505_v42, %v497_v41 }
 0x4d6   : > { %1776 = vtanh.f32 %v507_v43 }
 0x4e3   : > { %v1777_v44 = vpop.eup %1776 }
 0x4e4   : > { %510 = vrot.lane.b32.xlu1 %v1777_v44, %s2014_s8 }
 0x4e8   : > { %515 = vrot.lane.b32.xlu1 %v507_v43, %s2016_s6 }
 0x556   : > { %v511_v45 = vpop.permute.xlu1 %510 }
 0x557   : > { %v513_v46 = vmul.f32 %v1775_v37, %v511_v45 }
 0x559   : > { %520 = vrot.lane.b32.xlu0 %v513_v46, %s2015_s30 }
 0x55a   : > { %v516_v47 = vpop.permute.xlu1 %515 }
 0x55b   : > { %518 = vst.msk [vmem:[#allocation3] sm:$0xff] %vm274_vm0, %v516_v47 }
 0x562   : > { %v616_v48 = vld [vmem:[#allocation3] sm:$0xff] }
 0x563   : > { %618 = vrot.lane.b32.xlu1 %v616_v48, %s2015_s30 }
 0x5cb   : > { %v521_v49 = vpop.permute.xlu0 %520 }
 0x5cc   : > { %523 = vst.msk [vmem:[#allocation2] sm:$0xff] %vm274_vm0, %v521_v49  ;;  %525 = vst.msk [vmem:[%s524_s22] sm:$0xff] %vm274_vm0, %v521_v49  ;;  %s776_s22 = scalar_lea.vmem %s2207_s11, %s1540_s10 [#allocation4] }
 0x5cd   : > { %v777_v36 = vld [vmem:[%s776_s22] sm:$0xff]  ;;  %s2466_s10 = scalar_select %p2631_p5, 7, 0 }
 0x5cf   : > { %s1549_s22 = sshll.u32 %s2466_s10, 3 }
 0x5d3   : > { %v530_v50 = vld [vmem:[#allocation2] sm:$0xff] }
 0x5d4   : > { %1635 = vmatmul.mubr.msk.f32.vlgmr.msra.gmra.mxu0 %vm274_vm0, %v530_v50 }
 0x5d5   : > { %1649 = vmatpush3.msra.mxu0 %v2229_v1  ;;  %1656 = vmatprep.mubr.msk.f32.mxu0 %vm2013_vm1, %v2012_v0  ;;  %v619_v62 = vpop.permute.xlu1 %618 }
 0x5d6   : > { %1650 = vmatprep.subr.mxu0 %v2012_v0 }
 0x5d7   : > { %1651 = vmatpush3.msra.mxu0 %v2231_v2 }
 0x5d8   : > { %1652 = vmatprep.subr.mxu0 %v2012_v0 }
 0x5d9   : > { %1653 = vmatpush3.msra.mxu0 %v2236_v3 }
 0x5da   : > { %1654 = vmatprep.subr.mxu0 %v2012_v0 }
 0x5db   : > { %1655 = vmatpush3.msra.mxu0 %v2242_v4 }
 0x5dc   : > { %1670 = vmatprep.subr.mxu0 %v2012_v0 }
 0x694   : > { %v604_v52 = vpop.f32.mrf.mxu0 }
 0x695   : > { %v608_v53 = vadd.f32 %v604_v52, %v529_v51 }
 0x696   : > { %v1636_v54 = vpop.f32.mrf.mxu0 }
 0x697   : > { %1778 = vtanh.f32 %v608_v53  ;;  %v1536_v56 = vmul.f32 -1.442695, %v608_v53 }
 0x699   : > { %1780 = vpow2.f32 %v1536_v56 }
 0x6a4   : > { %v1779_v55 = vpop.eup %1778 }
 0x6a5   : > { %623 = vrot.lane.b32.xlu0 %v1779_v55, %s2014_s8 }
 0x6a6   : > { %v1781_v57 = vpop.eup %1780 }
 0x6a7   : > { %v612_v58 = vadd.f32 1.0, %v1781_v57 }
 0x6a9   : > { %1782 = vrcp.f32 %v612_v58 }
 0x6b6   : > { %v1783_v59 = vpop.eup %1782 }
 0x6b7   : > { %v621_v63 = vmul.f32 %v1783_v59, %v619_v62 }
 0x717   : > { %v624_v60 = vpop.permute.xlu0 %623 }
 0x718   : > { %v626_v61 = vmul.f32 %v1783_v59, %v624_v60 }
 0x71a   : > { %628 = vrot.lane.b32.xlu0 %v626_v61, %s2015_s30 }
 0x78c   : > { %v629_v5 = vpop.permute.xlu0 %628 }
 0x78d   : > { %v631_v6 = vadd.f32 %v629_v5, %v621_v63 }
 0x78f   : > { %1784 = vtanh.f32 %v631_v6 }
 0x79c   : > { %v1785_v7 = vpop.eup %1784 }
 0x79d   : > { %634 = vrot.lane.b32.xlu1 %v1785_v7, %s2014_s8 }
 0x7a1   : > { %639 = vrot.lane.b32.xlu1 %v631_v6, %s2016_s6 }
 0x80f   : > { %v635_v8 = vpop.permute.xlu1 %634 }
 0x810   : > { %v637_v9 = vmul.f32 %v1783_v59, %v635_v8 }
 0x812   : > { %644 = vrot.lane.b32.xlu0 %v637_v9, %s2015_s30 }
 0x813   : > { %v640_v10 = vpop.permute.xlu1 %639 }
 0x814   : > { %642 = vst.msk [vmem:[#allocation3] sm:$0xff] %vm274_vm0, %v640_v10 }
 0x81b   : > { %v740_v11 = vld [vmem:[#allocation3] sm:$0xff] }
 0x81c   : > { %742 = vrot.lane.b32.xlu1 %v740_v11, %s2015_s30 }
 0x884   : > { %v645_v12 = vpop.permute.xlu0 %644 }
 0x885   : > { %647 = vst.msk [vmem:[#allocation2] sm:$0xff] %vm274_vm0, %v645_v12  ;;  %649 = vst.msk [vmem:[%s648_s26] sm:$0xff] %vm274_vm0, %v645_v12  ;;  %s900_s26 = scalar_lea.vmem %s2207_s11, %s1543_s23 [#allocation4]  ;;  %s1298_s23 = sshll.u32 %s2282_s29, 4  ;;  %s2495_s23 = int_to_ptr.vmem [resolvable:$true] %s1298_s23 }
 0x88c   : > { %v654_v13 = vld [vmem:[#allocation2] sm:$0xff] }
 0x88d   : > { %1646 = vmatmul.mubr.msk.f32.vlgmr.msra.gmra.mxu1 %vm274_vm0, %v654_v13 }
 0x88e   : > { %1660 = vmatpush3.msra.mxu1 %v2229_v1  ;;  %1667 = vmatprep.mubr.msk.f32.mxu1 %vm2013_vm1, %v2012_v0  ;;  %v743_v25 = vpop.permute.xlu1 %742 }
 0x88f   : > { %1661 = vmatprep.subr.mxu1 %v2012_v0 }
 0x890   : > { %1662 = vmatpush3.msra.mxu1 %v2231_v2 }
 0x891   : > { %1663 = vmatprep.subr.mxu1 %v2012_v0 }
 0x892   : > { %1664 = vmatpush3.msra.mxu1 %v2236_v3 }
 0x893   : > { %1665 = vmatprep.subr.mxu1 %v2012_v0 }
 0x894   : > { %1666 = vmatpush3.msra.mxu1 %v2242_v4 }
 0x895   : > { %1681 = vmatprep.subr.mxu1 %v2012_v0 }
 0x94d   : > { %v728_v15 = vpop.f32.mrf.mxu1 }
 0x94e   : > { %v732_v16 = vadd.f32 %v728_v15, %v653_v14 }
 0x94f   : > { %v1647_v17 = vpop.f32.mrf.mxu1 }
 0x950   : > { %1786 = vtanh.f32 %v732_v16  ;;  %v1539_v19 = vmul.f32 -1.442695, %v732_v16 }
 0x952   : > { %1788 = vpow2.f32 %v1539_v19 }
 0x95d   : > { %v1787_v18 = vpop.eup %1786 }
 0x95e   : > { %747 = vrot.lane.b32.xlu0 %v1787_v18, %s2014_s8 }
 0x95f   : > { %v1789_v20 = vpop.eup %1788 }
 0x960   : > { %v736_v21 = vadd.f32 1.0, %v1789_v20 }
 0x962   : > { %1790 = vrcp.f32 %v736_v21 }
 0x96f   : > { %v1791_v22 = vpop.eup %1790 }
 0x970   : > { %v745_v26 = vmul.f32 %v1791_v22, %v743_v25 }
 0x9d0   : > { %v748_v23 = vpop.permute.xlu0 %747 }
 0x9d1   : > { %v750_v24 = vmul.f32 %v1791_v22, %v748_v23 }
 0x9d3   : > { %752 = vrot.lane.b32.xlu0 %v750_v24, %s2015_s30 }
 0xa45   : > { %v753_v27 = vpop.permute.xlu0 %752 }
 0xa46   : > { %v755_v28 = vadd.f32 %v753_v27, %v745_v26 }
 0xa48   : > { %1792 = vtanh.f32 %v755_v28 }
 0xa55   : > { %v1793_v29 = vpop.eup %1792 }
 0xa56   : > { %758 = vrot.lane.b32.xlu1 %v1793_v29, %s2014_s8 }
 0xa5a   : > { %763 = vrot.lane.b32.xlu1 %v755_v28, %s2016_s6 }
 0xac8   : > { %v759_v30 = vpop.permute.xlu1 %758 }
 0xac9   : > { %v761_v31 = vmul.f32 %v1791_v22, %v759_v30 }
 0xacb   : > { %768 = vrot.lane.b32.xlu0 %v761_v31, %s2015_s30 }
 0xacc   : > { %v764_v32 = vpop.permute.xlu1 %763 }
 0xacd   : > { %766 = vst.msk [vmem:[#allocation3] sm:$0xff] %vm274_vm0, %v764_v32 }
 0xad4   : > { %v864_v33 = vld [vmem:[#allocation3] sm:$0xff] }
 0xad5   : > { %866 = vrot.lane.b32.xlu1 %v864_v33, %s2015_s30 }
 0xb3d   : > { %v769_v34 = vpop.permute.xlu0 %768 }
 0xb3e   : > { %771 = vst.msk [vmem:[#allocation2] sm:$0xff] %vm274_vm0, %v769_v34  ;;  %773 = vst.msk [vmem:[%s772_s7] sm:$0xff] %vm274_vm0, %v769_v34  ;;  %s1024_s7 = scalar_lea.vmem %s2207_s11, %s1546_s25 [#allocation4]  ;;  %s1882_s25 = scalar_lea.vmem %s2495_s23, 1024 }
 0xb3f   : > { %v1025_v16 = vld [vmem:[%s1024_s7] sm:$0xff]  ;;  %p1883_p4 = scmp.ne.s32.totalorder %s2495_s23, %s1882_s25 }
 0xb41   : > { %p1884_p12 = pnand %p1883_p4, %p2632_p9 }
 0xb43   : > { %p1885_p3 = pneg %p1884_p12 }
 0xb45   : > { %v778_v35 = vld [vmem:[#allocation2] sm:$0xff] }
 0xb46   : > { %1657 = vmatmul.mubr.msk.f32.vlgmr.msra.gmra.mxu0 %vm274_vm0, %v778_v35 }
 0xb47   : > { %1671 = vmatpush3.msra.mxu0 %v2229_v1  ;;  %1678 = vmatprep.mubr.msk.f32.mxu0 %vm2013_vm1, %v2012_v0  ;;  %v867_v47 = vpop.permute.xlu1 %866 }
 0xb48   : > { %1672 = vmatprep.subr.mxu0 %v2012_v0 }
 0xb49   : > { %1673 = vmatpush3.msra.mxu0 %v2231_v2 }
 0xb4a   : > { %1674 = vmatprep.subr.mxu0 %v2012_v0 }
 0xb4b   : > { %1675 = vmatpush3.msra.mxu0 %v2236_v3 }
 0xb4c   : > { %1676 = vmatprep.subr.mxu0 %v2012_v0 }
 0xb4d   : > { %1677 = vmatpush3.msra.mxu0 %v2242_v4 }
 0xc06   : > { %v852_v37 = vpop.f32.mrf.mxu0 }
 0xc07   : > { %v856_v38 = vadd.f32 %v852_v37, %v777_v36 }
 0xc08   : > { %v1658_v39 = vpop.f32.mrf.mxu0 }
 0xc09   : > { %1794 = vtanh.f32 %v856_v38  ;;  %v1542_v41 = vmul.f32 -1.442695, %v856_v38 }
 0xc0b   : > { %1796 = vpow2.f32 %v1542_v41 }
 0xc16   : > { %v1795_v40 = vpop.eup %1794 }
 0xc17   : > { %871 = vrot.lane.b32.xlu0 %v1795_v40, %s2014_s8 }
 0xc18   : > { %v1797_v42 = vpop.eup %1796 }
 0xc19   : > { %v860_v43 = vadd.f32 1.0, %v1797_v42 }
 0xc1b   : > { %1798 = vrcp.f32 %v860_v43 }
 0xc28   : > { %v1799_v44 = vpop.eup %1798 }
 0xc29   : > { %v869_v48 = vmul.f32 %v1799_v44, %v867_v47 }
 0xc89   : > { %v872_v45 = vpop.permute.xlu0 %871 }
 0xc8a   : > { %v874_v46 = vmul.f32 %v1799_v44, %v872_v45 }
 0xc8c   : > { %876 = vrot.lane.b32.xlu0 %v874_v46, %s2015_s30 }
 0xcfe   : > { %v877_v49 = vpop.permute.xlu0 %876 }
 0xcff   : > { %v879_v50 = vadd.f32 %v877_v49, %v869_v48 }
 0xd01   : > { %1800 = vtanh.f32 %v879_v50 }
 0xd0e   : > { %v1801_v51 = vpop.eup %1800 }
 0xd0f   : > { %882 = vrot.lane.b32.xlu1 %v1801_v51, %s2014_s8 }
 0xd13   : > { %887 = vrot.lane.b32.xlu1 %v879_v50, %s2016_s6 }
 0xd81   : > { %v883_v52 = vpop.permute.xlu1 %882 }
 0xd82   : > { %v885_v53 = vmul.f32 %v1799_v44, %v883_v52 }
 0xd84   : > { %892 = vrot.lane.b32.xlu0 %v885_v53, %s2015_s30 }
 0xd85   : > { %v888_v54 = vpop.permute.xlu1 %887 }
 0xd86   : > { %890 = vst.msk [vmem:[#allocation3] sm:$0xff] %vm274_vm0, %v888_v54 }
 0xd8d   : > { %v988_v55 = vld [vmem:[#allocation3] sm:$0xff] }
 0xd8e   : > { %990 = vrot.lane.b32.xlu1 %v988_v55, %s2015_s30 }
 0xdf6   : > { %v893_v56 = vpop.permute.xlu0 %892 }
 0xdf7   : > { %895 = vst.msk [vmem:[#allocation2] sm:$0xff] %vm274_vm0, %v893_v56  ;;  %897 = vst.msk [vmem:[%s896_s13] sm:$0xff] %vm274_vm0, %v893_v56  ;;  %s1148_s13 = scalar_lea.vmem %s2207_s11, %s1549_s22 [#allocation4]  ;;  %s1526_s11 = sshll.u32 %s2201_s20, 3 }
 0xdf8   : > { %v1149_v38 = vld [vmem:[%s1148_s13] sm:$0xff]  ;;  %s2481_s14 = scalar_lea.vmem [#allocation12], %s1526_s11 }
 0xdfe   : > { %v902_v57 = vld [vmem:[#allocation2] sm:$0xff] }
 0xdff   : > { %1668 = vmatmul.mubr.msk.f32.vlgmr.msra.gmra.mxu1 %vm274_vm0, %v902_v57 }
 0xe00   : > { %1682 = vmatpush3.msra.mxu1 %v2229_v1  ;;  %1689 = vmatprep.mubr.msk.f32.mxu1 %vm2013_vm1, %v2012_v0  ;;  %v901_v1 = vld [vmem:[%s900_s26] sm:$0xff]  ;;  %v991_v5 = vpop.permute.xlu1 %990 }
 0xe01   : > { %1683 = vmatprep.subr.mxu1 %v2012_v0 }
 0xe02   : > { %1684 = vmatpush3.msra.mxu1 %v2231_v2 }
 0xe03   : > { %1685 = vmatprep.subr.mxu1 %v2012_v0 }
 0xe04   : > { %1686 = vmatpush3.msra.mxu1 %v2236_v3 }
 0xe05   : > { %1687 = vmatprep.subr.mxu1 %v2012_v0 }
 0xe06   : > { %1688 = vmatpush3.msra.mxu1 %v2242_v4 }
 0xebf   : > { %v976_v58 = vpop.f32.mrf.mxu1 }
 0xec0   : > { %v980_v59 = vadd.f32 %v976_v58, %v901_v1 }
 0xec1   : > { %v1669_v2 = vpop.f32.mrf.mxu1 }
 0xec2   : > { %1802 = vtanh.f32 %v980_v59  ;;  %v1545_v3 = vmul.f32 -1.442695, %v980_v59 }
 0xec4   : > { %1804 = vpow2.f32 %v1545_v3 }
 0xecf   : > { %v1803_v60 = vpop.eup %1802 }
 0xed0   : > { %995 = vrot.lane.b32.xlu0 %v1803_v60, %s2014_s8 }
 0xed1   : > { %v1805_v0 = vpop.eup %1804 }
 0xed2   : > { %v984_v4 = vadd.f32 1.0, %v1805_v0 }
 0xed4   : > { %1806 = vrcp.f32 %v984_v4 }
 0xee1   : > { %v1807_v61 = vpop.eup %1806 }
 0xee2   : > { %v993_v6 = vmul.f32 %v1807_v61, %v991_v5 }
 0xf42   : > { %v996_v62 = vpop.permute.xlu0 %995 }
 0xf43   : > { %v998_v63 = vmul.f32 %v1807_v61, %v996_v62 }
 0xf45   : > { %1000 = vrot.lane.b32.xlu0 %v998_v63, %s2015_s30 }
 0xfb7   : > { %v1001_v7 = vpop.permute.xlu0 %1000 }
 0xfb8   : > { %v1003_v8 = vadd.f32 %v1001_v7, %v993_v6 }
 0xfba   : > { %1808 = vtanh.f32 %v1003_v8 }
 0xfc7   : > { %v1809_v9 = vpop.eup %1808 }
 0xfc8   : > { %1006 = vrot.lane.b32.xlu1 %v1809_v9, %s2014_s8 }
 0xfcc   : > { %1011 = vrot.lane.b32.xlu1 %v1003_v8, %s2016_s6 }
0x103a   : > { %v1007_v10 = vpop.permute.xlu1 %1006 }
0x103b   : > { %v1009_v11 = vmul.f32 %v1807_v61, %v1007_v10 }
0x103d   : > { %1016 = vrot.lane.b32.xlu0 %v1009_v11, %s2015_s30 }
0x103e   : > { %v1012_v12 = vpop.permute.xlu1 %1011 }
0x103f   : > { %1014 = vst.msk [vmem:[#allocation3] sm:$0xff] %vm274_vm0, %v1012_v12 }
0x1046   : > { %v1112_v13 = vld [vmem:[#allocation3] sm:$0xff] }
0x1047   : > { %1114 = vrot.lane.b32.xlu1 %v1112_v13, %s2015_s30 }
0x10af   : > { %v1017_v14 = vpop.permute.xlu0 %1016 }
0x10b0   : > { %1019 = vst.msk [vmem:[#allocation2] sm:$0xff] %vm274_vm0, %v1017_v14  ;;  %1021 = vst.msk [vmem:[%s1020_s5] sm:$0xff] %vm274_vm0, %v1017_v14 }
0x10b7   : > { %v1026_v15 = vld [vmem:[#allocation2] sm:$0xff] }
0x10b8   : > { %1679 = vmatmul.mubr.msk.f32.vlgmr.msra.gmra.mxu0 %vm274_vm0, %v1026_v15 }
0x10b9   : > { %v1115_v27 = vpop.permute.xlu1 %1114 }
0x1178   : > { %v1100_v17 = vpop.f32.mrf.mxu0 }
0x1179   : > { %v1104_v18 = vadd.f32 %v1100_v17, %v1025_v16 }
0x117a   : > { %v1680_v19 = vpop.f32.mrf.mxu0 }
0x117b   : > { %1810 = vtanh.f32 %v1104_v18  ;;  %v1548_v21 = vmul.f32 -1.442695, %v1104_v18 }
0x117d   : > { %1812 = vpow2.f32 %v1548_v21 }
0x1188   : > { %v1811_v20 = vpop.eup %1810 }
0x1189   : > { %1119 = vrot.lane.b32.xlu0 %v1811_v20, %s2014_s8 }
0x118a   : > { %v1813_v22 = vpop.eup %1812 }
0x118b   : > { %v1108_v23 = vadd.f32 1.0, %v1813_v22 }
0x118d   : > { %1814 = vrcp.f32 %v1108_v23 }
0x119a   : > { %v1815_v24 = vpop.eup %1814 }
0x119b   : > { %v1117_v28 = vmul.f32 %v1815_v24, %v1115_v27 }
0x11fb   : > { %v1120_v25 = vpop.permute.xlu0 %1119 }
0x11fc   : > { %v1122_v26 = vmul.f32 %v1815_v24, %v1120_v25 }
0x11fe   : > { %1124 = vrot.lane.b32.xlu0 %v1122_v26, %s2015_s30 }
0x1270   : > { %v1125_v29 = vpop.permute.xlu0 %1124 }
0x1271   : > { %v1127_v30 = vadd.f32 %v1125_v29, %v1117_v28 }
0x1273   : > { %1816 = vtanh.f32 %v1127_v30 }
0x1280   : > { %v1817_v31 = vpop.eup %1816 }
0x1281   : > { %1130 = vrot.lane.b32.xlu1 %v1817_v31, %s2014_s8 }
0x1285   : > { %1135 = vrot.lane.b32.xlu1 %v1127_v30, %s2016_s6 }
0x12f3   : > { %v1131_v32 = vpop.permute.xlu1 %1130 }
0x12f4   : > { %v1133_v33 = vmul.f32 %v1815_v24, %v1131_v32 }
0x12f6   : > { %1140 = vrot.lane.b32.xlu0 %v1133_v33, %s2015_s30 }
0x12f7   : > { %v1136_v34 = vpop.permute.xlu1 %1135 }
0x12f8   : > { %1138 = vst.msk [vmem:[#allocation3] sm:$0xff] %vm274_vm0, %v1136_v34 }
0x12ff   : > { %v1236_v35 = vld [vmem:[#allocation3] sm:$0xff] }
0x1300   : > { %1238 = vrot.lane.b32.xlu1 %v1236_v35, %s2015_s30 }
0x1368   : > { %v1141_v36 = vpop.permute.xlu0 %1140 }
0x1369   : > { %1143 = vst.msk [vmem:[#allocation2] sm:$0xff] %vm274_vm0, %v1141_v36  ;;  %1145 = vst.msk [vmem:[%s1144_s12] sm:$0xff] %vm274_vm0, %v1141_v36 }
0x1370   : > { %v1150_v37 = vld [vmem:[#allocation2] sm:$0xff] }
0x1371   : > { %1690 = vmatmul.mubr.msk.f32.vlgmr.msra.gmra.mxu1 %vm274_vm0, %v1150_v37 }
0x1372   : > { %v1239_v49 = vpop.permute.xlu1 %1238 }
0x1431   : > { %v1224_v39 = vpop.f32.mrf.mxu1 }
0x1432   : > { %v1228_v40 = vadd.f32 %v1224_v39, %v1149_v38 }
0x1433   : > { %v1691_v41 = vpop.f32.mrf.mxu1 }
0x1434   : > { %1818 = vtanh.f32 %v1228_v40  ;;  %v1551_v43 = vmul.f32 -1.442695, %v1228_v40 }
0x1436   : > { %1820 = vpow2.f32 %v1551_v43 }
0x1441   : > { %v1819_v42 = vpop.eup %1818 }
0x1442   : > { %1243 = vrot.lane.b32.xlu0 %v1819_v42, %s2014_s8 }
0x1443   : > { %v1821_v44 = vpop.eup %1820 }
0x1444   : > { %v1232_v45 = vadd.f32 1.0, %v1821_v44 }
0x1446   : > { %1822 = vrcp.f32 %v1232_v45 }
0x1453   : > { %v1823_v46 = vpop.eup %1822 }
0x1454   : > { %v1241_v50 = vmul.f32 %v1823_v46, %v1239_v49 }
0x14b4   : > { %v1244_v47 = vpop.permute.xlu0 %1243 }
0x14b5   : > { %v1246_v48 = vmul.f32 %v1823_v46, %v1244_v47 }
0x14b7   : > { %1248 = vrot.lane.b32.xlu0 %v1246_v48, %s2015_s30 }
0x1529   : > { %v1249_v51 = vpop.permute.xlu0 %1248 }
0x152a   : > { %v1251_v52 = vadd.f32 %v1249_v51, %v1241_v50 }
0x152c   : > { %1824 = vtanh.f32 %v1251_v52 }
0x1539   : > { %v1825_v53 = vpop.eup %1824 }
0x153a   : > { %1254 = vrot.lane.b32.xlu1 %v1825_v53, %s2014_s8  ;;  %s1563_s8 = sshll.u32 %s2068_s19, 10 }
0x153e   : > { %1259 = vrot.lane.b32.xlu1 %v1251_v52, %s2016_s6  ;;  %s1268_s6 = scalar_lea.vmem %s2282_s29, %s1549_s22 [#allocation9]  ;;  %s2017_s29 = smov [#allocation9]  }
0x153f   : > { %s1886_s7 = sshll.u32 %s2017_s29, 4  ;;  %s1887_s7 = int_to_ptr.vmem [resolvable:$false] %s1886_s7 }
0x1540   : > { %s1888_s12 = scalar_lea.vmem %s1887_s7, 2048  ;;  %p1889_p8 = scmp.lt.s32.totalorder %s2495_s23, %s1887_s7 }
0x1541   : > { %p1890_p6 = scmp.lt.s32.totalorder %s1888_s12, %s1882_s25 }
0x1543   : > { %p1891_p13 = por %p1890_p6, %p1889_p8 }
0x1545   : > { %p1892_p1 = pnand %p1891_p13, %p1885_p3 }
0x15ac   : > { %v1255_v54 = vpop.permute.xlu1 %1254 }
0x15ad   : > { %v1257_v55 = vmul.f32 %v1823_v46, %v1255_v54 }
0x15af   : > { %1264 = vrot.lane.b32.xlu0 %v1257_v55, %s2015_s30  ;;  %s2493_s30 = scalar_lea.hbm %s2608_s2, %s1563_s8 }
0x15b0   : > { %v1260_v56 = vpop.permute.xlu1 %1259 }
0x15b1   : > { %1262 = vst.msk [vmem:[#allocation3] sm:$0xff] %vm274_vm0, %v1260_v56 }
0x15b8   : > { %v1272_v57 = vld [vmem:[#allocation3] sm:$0xff] }
0x15b9   : > { %1273 = vst.msk [vmem:[%s2481_s14] sm:$0xff] %vm274_vm0, %v1272_v57 }
0x1621   : > { %v1265_v1 = vpop.permute.xlu0 %1264 }
0x1622   : > { %1267 = vst.msk [vmem:[#allocation2] sm:$0xff] %vm274_vm0, %v1265_v1  ;;  %1269 = vst.msk [vmem:[%s1268_s6] sm:$0xff] %vm274_vm0, %v1265_v1 }
0x1623   : > { %1895 = shalt.err (!%p1892_p1)
}
0x1624   : > { %s1896_s10 = scalar_lea.hbm %s2493_s30, 1024  ;;  %s1900_s8 = scalar_lea.hbm %s2608_s2, 2048 }
0x1625   : > { %p1897_p11 = scmp.ne.s32.totalorder %s2493_s30, %s1896_s10  ;;  %p1901_p0 = scmp.lt.s32.totalorder %s2493_s30, %s2608_s2 }
0x1626   : > { %p1902_p2 = scmp.lt.s32.totalorder %s1900_s8, %s1896_s10 }
0x1627   : > { %p1898_p7 = pnand %p1897_p11, %p2632_p9 }
0x1628   : > { %p1903_p5 = por %p1902_p2, %p1901_p0 }
0x1629   : > { %p1899_p10 = pneg %p1898_p7 }
0x162b   : > { %p1904_p4 = pnand %p1903_p5, %p1899_p10 }
0x162d   : > { %1907 = shalt.err (!%p1904_p4)
}
0x162e   : > { %s2018_s5 = smov 128   ;;  %s2019_s25 = smov 8   ;;  %v1270_v58 = vld [vmem:[#allocation2] sm:$0xff] }
0x162f   : > { %1696 = dma.vmem_to_hbm [thread:$0]  (%p2632_p9), %s2495_s23, 1024, %s2493_s30, %s1275_s9, %s2018_s5, %s2018_s5, %s2019_s25  }
0x1630   : > { %s1279_s29 = sand.u32 1, %s2068_s19   ;;  %s1557_s7 = sshll.u32 %s2068_s19, 7 }
0x1631   : > { %s266_s12 = scalar_lea.vmem [#allocation10], %s1526_s11  ;;  %s1327_s22 = sshll.u32 %s2481_s14, 4  ;;  %s2539_s22 = int_to_ptr.vmem [resolvable:$true] %s1327_s22 }
0x1632   : > { %s1314_s10 = sshll.u32 %s266_s12, 4  ;;  %s2530_s6 = scalar_lea.hbm %s2609_s3, %s1557_s7  ;;  %1271 = vst.msk [vmem:[%s266_s12] sm:$0xff] %vm274_vm0, %v1270_v58  ;;  %s2532_s10 = int_to_ptr.vmem [resolvable:$true] %s1314_s10 }
0x1633   : > { %s2537_s23 = scalar_lea.hbm %s2610_s4, %s1557_s7  ;;  %s2542_s19 = scalar_lea.sflag [#allocation11], %s1279_s29 }
0x1634   : > { %s1908_s20 = scalar_lea.vmem %s2532_s10, 128  ;;  %s2020_s11 = smov [#allocation10]  }
0x1635   : > { %p1909_p12 = scmp.ne.s32.totalorder %s2532_s10, %s1908_s20  ;;  %s1912_s14 = sshll.u32 %s2020_s11, 4  ;;  %s1913_s14 = int_to_ptr.vmem [resolvable:$false] %s1912_s14 }
0x1636   : > { %s1914_s30 = scalar_lea.vmem %s1913_s14, 256  ;;  %p1915_p6 = scmp.lt.s32.totalorder %s2532_s10, %s1913_s14 }
0x1637   : > { %p1910_p3 = pnand %p1909_p12, %p2632_p9  ;;  %p1916_p13 = scmp.lt.s32.totalorder %s1914_s30, %s1908_s20 }
0x1639   : > { %p1911_p8 = pneg %p1910_p3  ;;  %p1917_p1 = por %p1916_p13, %p1915_p6 }
0x163b   : > { %p1918_p11 = pnand %p1917_p1, %p1911_p8 }
0x163d   : > { %1921 = shalt.err (!%p1918_p11)
}
0x163e   : > { %s1922_s0 = scalar_lea.hbm %s2530_s6, 128  ;;  %s1926_s25 = scalar_lea.hbm %s2609_s3, 256 }
0x163f   : > { %p1923_p7 = scmp.ne.s32.totalorder %s2530_s6, %s1922_s0  ;;  %p1927_p2 = scmp.lt.s32.totalorder %s2530_s6, %s2609_s3 }
0x1640   : > { %p1928_p5 = scmp.lt.s32.totalorder %s1926_s25, %s1922_s0 }
0x1641   : > { %p1924_p10 = pnand %p1923_p7, %p2632_p9 }
0x1642   : > { %p1929_p4 = por %p1928_p5, %p1927_p2 }
0x1643   : > { %p1925_p0 = pneg %p1924_p10 }
0x1645   : > { %p1930_p12 = pnand %p1929_p4, %p1925_p0 }
0x1647   : > { %1933 = shalt.err (!%p1930_p12)
}
0x1648   : > { %1697 = dma.vmem_to_hbm [thread:$0]  (%p2632_p9), %s2532_s10, 128, %s2530_s6, %s2542_s19  }
0x1649   : > { %s1934_s12 = scalar_lea.vmem %s2539_s22, 128  ;;  %s2021_s13 = smov [#allocation12]  }
0x164a   : > { %p1935_p3 = scmp.ne.s32.totalorder %s2539_s22, %s1934_s12  ;;  %s1938_s8 = sshll.u32 %s2021_s13, 4  ;;  %s1939_s8 = int_to_ptr.vmem [resolvable:$false] %s1938_s8 }
0x164b   : > { %s1940_s26 = scalar_lea.vmem %s1939_s8, 256  ;;  %p1941_p13 = scmp.lt.s32.totalorder %s2539_s22, %s1939_s8 }
0x164c   : > { %p1936_p8 = pnand %p1935_p3, %p2632_p9  ;;  %p1942_p1 = scmp.lt.s32.totalorder %s1940_s26, %s1934_s12 }
0x164e   : > { %p1937_p6 = pneg %p1936_p8  ;;  %p1943_p11 = por %p1942_p1, %p1941_p13 }
0x1650   : > { %p1944_p7 = pnand %p1943_p11, %p1937_p6 }
0x1652   : > { %1947 = shalt.err (!%p1944_p7)
}
0x1653   : > { %s1948_s20 = scalar_lea.hbm %s2537_s23, 128  ;;  %s1952_s11 = scalar_lea.hbm %s2610_s4, 256 }
0x1654   : > { %p1949_p10 = scmp.ne.s32.totalorder %s2537_s23, %s1948_s20  ;;  %p1953_p5 = scmp.lt.s32.totalorder %s2537_s23, %s2610_s4 }
0x1655   : > { %p1954_p4 = scmp.lt.s32.totalorder %s1952_s11, %s1948_s20 }
0x1656   : > { %p1950_p0 = pnand %p1949_p10, %p2632_p9 }
0x1657   : > { %p1955_p12 = por %p1954_p4, %p1953_p5 }
0x1658   : > { %p1951_p2 = pneg %p1950_p0 }
0x165a   : > { %p1956_p3 = pnand %p1955_p12, %p1951_p2 }
0x165c   : > { %1959 = shalt.err (!%p1956_p3)
}
0x165d   : > { %1698 = dma.vmem_to_hbm [thread:$0]  (%p2632_p9), %s2539_s22, 128, %s2537_s23, %s2542_s19  }
0x165e PF: > { %s1339_s0 = sand.u32 1, %s1994_s15   ;;  %p2633_p8 = scmp.ne.s32.totalorder %s2619_s28, 0 }
0x165f   : > { %p2634_p6 = scmp.ge.s32.totalorder %s2006_s18, 2  ;;  %s1340_s9 = scalar_lea.sflag [#allocation6], %s1339_s0 }
0x1661   : > { %p1710_p13 = pnand %p2634_p6, %p2633_p8 }
0x1663   : > { %p1711_p1 = pneg %p1710_p13 }
0x1665   : > { %1985 = dma.done.wait (%p1711_p1), %s1340_s9, 1024  }
0x1666   : > { %1987 = vsyncadd (%p1711_p1), %s1340_s9, 4294966272  ;;  %s2635_s5 = sadd.s32 4294967294, %s2006_s18  }
0x1667   : > { %s1348_s25 = sand.u32 1, %s2635_s5  }
0x1668   : > { %s1349_s27 = scalar_lea.sflag [#allocation11], %s1348_s25 }
0x1669   : > { %1989 = dma.done.wait (%p1711_p1), %s1349_s27, 256  }
0x166a   : > { %1991 = vsyncadd (%p1711_p1), %s1349_s27, 4294967040  ;;  %p24_p9 = scmp.ge.s32.totalorder %s2072_s21, 4   ;;  %s2636_s15 = smov %s1998_s16 }
0x166b   : > { %s2637_s16 = smov %s2002_s17  ;;  %s2638_s17 = smov %s2084_s24 }
0x166c   : > { %s2639_s18 = smov %s2072_s21  ;;  %26 = sbr.rel (!%p24_p9) target bundleno = 11 (0xb), region = 134 }
0x1671   :  { %1363 = vsyncpa [#allocation5], 1 }
0x1672   :  { %1365 = vsyncpa [#allocation5 + $0x1], 1 }
0x1673   :  { %1366 = vsyncpa [#allocation8], 1 }
0x1674   :  { %1368 = vsyncpa [#allocation8 + $0x1], 1 }
0x1675   :  { %1369 = vsyncpa [#allocation6], 1 }
0x1676   :  { %1371 = vsyncpa [#allocation6 + $0x1], 1 }
0x1677   :  { %1372 = vsyncpa [#allocation11], 1 }
0x1678   :  { %1374 = vsyncpa [#allocation11 + $0x1], 1 }

</bundles_post_ra>
